<compile_context>
chip_gen: v6e
topology: v6e:2x2x1
jax: 0.10.0
libtpu: 0.0.40
codegen_flags: <defaults>
</compile_context>

<pallas_src>
import functools

import jax
import jax.numpy as jnp
from jax.experimental import pallas as pl
from jax.experimental.pallas import tpu as pltpu

M = 32             # hidden width of the PINN MLP
MAX_TILE_N = 8192  # max batch tile (lane axis) per grid step


def _pinn_kernel(xt_ref, wh_ref, vec_ref, o_ref):
    """Lane-dense transposed MLP.

    xt_ref : (1, tile_n)  collocation points, batch on the lane axis
    wh_ref : (3, m, m)    hidden-layer weights in (out, in) layout
    vec_ref: (m, 8)       packed columns: [w1, b1, b2, b3, b4, w5, b5@row0, pad]
    o_ref  : (1, tile_n)  network output (lane-dense)
    """
    x = xt_ref[...]                          # (1, T)

    w1 = vec_ref[:, 0:1]                     # (m, 1)
    b1 = vec_ref[:, 1:2]
    b2 = vec_ref[:, 2:3]
    b3 = vec_ref[:, 3:4]
    b4 = vec_ref[:, 4:5]
    w5 = vec_ref[:, 5:6]                     # (m, 1)
    b5 = vec_ref[0:1, 6:7]                   # (1, 1)

    hi = jax.lax.Precision.HIGHEST           # full-f32 MXU passes (cheap; MXU has slack)

    # Layer 1: K=1 contraction is a pure outer product -> keep it on the VPU.
    h = jnp.tanh(w1 * x + b1)                # (m, T)

    # Layers 2-4: (m, m) @ (m, T) on the MXU with lane-dense activations.
    h = jnp.tanh(jnp.dot(wh_ref[0], h, precision=hi,
                         preferred_element_type=jnp.float32) + b2)
    h = jnp.tanh(jnp.dot(wh_ref[1], h, precision=hi,
                         preferred_element_type=jnp.float32) + b3)
    h = jnp.tanh(jnp.dot(wh_ref[2], h, precision=hi,
                         preferred_element_type=jnp.float32) + b4)

    # Layer 5: m -> 1 as elementwise multiply + sublane reduction (lane-dense out).
    out = jnp.sum(w5 * h, axis=0, keepdims=True) + b5   # (1, T)
    o_ref[...] = out.astype(o_ref.dtype)


def _num_tensorcores_per_device():
    """TensorCores per JAX device: 2 on v7x (and v4/v5p megacore), else 1."""
    try:
        kind = getattr(jax.devices()[0], "device_kind", "").lower()
    except Exception:
        return 1
    if ("v7" in kind) or ("7x" in kind) or ("v5p" in kind) or ("v4" in kind):
        return 2
    return 1


def _choose_tile(n, max_tile, num_cores):
    """Lane-aligned (multiple of 128) batch tile.

    Single-TC chips (v5e/v6e): one big tile — the grid is a serial loop, extra
    steps only add padding and per-step overhead.
    Dual-TC chips (v7x): split into >= num_cores tiles so the 'parallel' grid
    axis shards across both TensorCores, with minimal padded lanes.
    """
    if num_cores > 1 and n > 128:
        per_core = pl.cdiv(n, num_cores)
        target = ((per_core + 127) // 128) * 128
    else:
        target = ((n + 127) // 128) * 128
    target = max(128, target)
    return min(max_tile, target)


def _pack_params(params):
    """Pack 10 tiny torch-layout params ((in,out) W, (1,out) b) into two slabs."""
    w1, b1, w2, b2, w3, b3, w4, b4, w5, b5 = params
    m = w2.shape[0]
    wh = jnp.stack([w2.T, w3.T, w4.T])                        # (3, m, m), (out, in)
    b5_col = jnp.zeros((m, 1), jnp.float32).at[0, 0].set(b5[0, 0])
    vec = jnp.concatenate(
        [w1.T, b1.T, b2.T, b3.T, b4.T, w5, b5_col,
         jnp.zeros((m, 1), jnp.float32)], axis=1)             # (m, 8)
    return wh, vec


@functools.partial(jax.jit, static_argnames=("max_tile", "num_cores"))
def _pinn_forward_impl(x, params, max_tile, num_cores):
    n = x.shape[0]
    m = params[2].shape[0]

    wh, vec = _pack_params(params)

    tile = _choose_tile(n, max_tile, num_cores)
    n_pad = pl.cdiv(n, tile) * tile
    grid = (n_pad // tile,)

    x_t = x.reshape(1, n).astype(jnp.float32)
    if n_pad != n:
        x_t = jnp.pad(x_t, ((0, 0), (0, n_pad - n)))          # ragged tail -> zero pad

    out_t = pl.pallas_call(
        _pinn_kernel,
        out_shape=jax.ShapeDtypeStruct((1, n_pad), jnp.float32),
        grid_spec=pltpu.PrefetchScalarGridSpec(
            num_scalar_prefetch=0,
            grid=grid,
            in_specs=[
                pl.BlockSpec((1, tile), lambda i: (0, i)),     # x: tiled on lanes
                pl.BlockSpec(wh.shape, lambda i: (0, 0, 0)),   # weights: resident
                pl.BlockSpec(vec.shape, lambda i: (0, 0)),     # packed vectors: resident
            ],
            out_specs=pl.BlockSpec((1, tile), lambda i: (0, i)),
        ),
        compiler_params=pltpu.CompilerParams(
            dimension_semantics=("parallel",)),
        # Advisory cost for the real (unpadded) work.
        cost_estimate=pl.CostEstimate(
            flops=2 * n * (m + 3 * m * m + m),
            transcendentals=4 * m * n,
            bytes_accessed=4 * (2 * n + 3 * m * m + 8 * m)),
    )(x_t, wh, vec)

    return out_t[0, :n].reshape(n, 1)


def pinn_forward(x, params, max_tile=MAX_TILE_N):
    """Pallas forward pass of the PINN MLP.

    x: (N, 1) float32 collocation points (any N; padded internally).
    params: (w1, b1, ..., w5, b5) with w_i (in, out), b_i (1, out) — same
            convention as the plain-JAX / PyTorch reference.
    """
    return _pinn_forward_impl(x, params, max_tile, _num_tensorcores_per_device())


def init_pinn_params(key, m=M):
    """Deterministic init matching torch.nn.Linear defaults (U(-1/sqrt(fan_in), +))."""
    dims = [(1, m), (m, m), (m, m), (m, m), (m, 1)]
    params = []
    for (fan_in, fan_out) in dims:
        key, kw, kb = jax.random.split(key, 3)
        bound = 1.0 / (fan_in ** 0.5)
        w = jax.random.uniform(kw, (fan_in, fan_out), jnp.float32, -bound, bound)
        b = jax.random.uniform(kb, (1, fan_out), jnp.float32, -bound, bound)
        params += [w, b]
    return tuple(params)


def pinn_reference(x, params):
    """Plain-JAX reference identical to the PyTorch forward."""
    w1, b1, w2, b2, w3, b3, w4, b4, w5, b5 = params
    h = jnp.tanh(x @ w1 + b1)
    h = jnp.tanh(h @ w2 + b2)
    h = jnp.tanh(h @ w3 + b3)
    h = jnp.tanh(h @ w4 + b4)
    return h @ w5 + b5


if __name__ == "__main__":
    key = jax.random.PRNGKey(0)
    kp, kx = jax.random.split(key)

    params = init_pinn_params(kp, m=M)

    # Small 1-D collocation batch; deliberately NOT a multiple of 128 so the
    # padded-tail path is exercised (single tile on v5e/v6e, two tiles on v7x).
    N = 300
    x = jax.random.uniform(kx, (N, 1), jnp.float32, 0.0, 1.0)

    out = jax.block_until_ready(pinn_forward(x, params))

    ref = pinn_reference(x, params)
    assert out.shape == (N, 1)
    assert jnp.allclose(out, ref, atol=2e-5, rtol=2e-5), float(
        jnp.max(jnp.abs(out - ref)))

    # Also exercise a larger batch (multi-tile on every generation).
    N2 = 20000
    x2 = jax.random.uniform(jax.random.PRNGKey(1), (N2, 1), jnp.float32, 0.0, 1.0)
    out2 = jax.block_until_ready(pinn_forward(x2, params))
    ref2 = pinn_reference(x2, params)
    assert jnp.allclose(out2, ref2, atol=2e-5, rtol=2e-5), float(
        jnp.max(jnp.abs(out2 - ref2)))

    print("KERNEL_OK")
</pallas_src>

<mosaic_0001>
module attributes {stable_mosaic.version = 11 : i64} {
  func.func @_pinn_kernel(%arg0: i32, %arg1: memref<1x384xf32, #tpu.memory_space<vmem>>, %arg2: memref<3x32x32xf32, #tpu.memory_space<vmem>>, %arg3: memref<32x8xf32, #tpu.memory_space<vmem>>, %arg4: memref<1x384xf32, #tpu.memory_space<vmem>>) attributes {dimension_semantics = [#tpu.dimension_semantics<parallel>], iteration_bounds = array<i64: 1>, scalar_prefetch = 0 : i64, scratch_operands = 0 : i64, tpu.core_type = #tpu.core_type<tc>, window_params = [{transform_indices = @transform_0, window_bounds = array<i64: 1, 384>}, {pipeline_mode = #tpu.pipeline_mode<synchronous>, transform_indices = @transform_1, window_bounds = array<i64: 3, 32, 32>}, {pipeline_mode = #tpu.pipeline_mode<synchronous>, transform_indices = @transform_2, window_bounds = array<i64: 32, 8>}, {transform_indices = @transform_3, window_bounds = array<i64: 1, 384>}]} {
    %c0 = arith.constant 0 : index
    %c0_0 = arith.constant 0 : index
    %0 = vector.load %arg1[%c0, %c0_0] : memref<1x384xf32, #tpu.memory_space<vmem>>, vector<1x384xf32>
    %c0_1 = arith.constant 0 : index
    %c0_2 = arith.constant 0 : index
    %1 = vector.load %arg3[%c0_1, %c0_2] : memref<32x8xf32, #tpu.memory_space<vmem>>, vector<32x1xf32>
    %c0_3 = arith.constant 0 : index
    %c1 = arith.constant 1 : index
    %2 = vector.load %arg3[%c0_3, %c1] : memref<32x8xf32, #tpu.memory_space<vmem>>, vector<32x1xf32>
    %c0_4 = arith.constant 0 : index
    %c2 = arith.constant 2 : index
    %3 = vector.load %arg3[%c0_4, %c2] : memref<32x8xf32, #tpu.memory_space<vmem>>, vector<32x1xf32>
    %c0_5 = arith.constant 0 : index
    %c3 = arith.constant 3 : index
    %4 = vector.load %arg3[%c0_5, %c3] : memref<32x8xf32, #tpu.memory_space<vmem>>, vector<32x1xf32>
    %c0_6 = arith.constant 0 : index
    %c4 = arith.constant 4 : index
    %5 = vector.load %arg3[%c0_6, %c4] : memref<32x8xf32, #tpu.memory_space<vmem>>, vector<32x1xf32>
    %c0_7 = arith.constant 0 : index
    %c5 = arith.constant 5 : index
    %6 = vector.load %arg3[%c0_7, %c5] : memref<32x8xf32, #tpu.memory_space<vmem>>, vector<32x1xf32>
    %c0_8 = arith.constant 0 : index
    %c6 = arith.constant 6 : index
    %7 = vector.load %arg3[%c0_8, %c6] : memref<32x8xf32, #tpu.memory_space<vmem>>, vector<1x1xf32>
    %8 = vector.broadcast %1 : vector<32x1xf32> to vector<32x384xf32>
    %9 = vector.broadcast %0 : vector<1x384xf32> to vector<32x384xf32>
    %10 = arith.mulf %8, %9 : vector<32x384xf32>
    %11 = vector.broadcast %2 : vector<32x1xf32> to vector<32x384xf32>
    %12 = arith.addf %10, %11 : vector<32x384xf32>
    %13 = math.tanh %12 : vector<32x384xf32>
    %c0_9 = arith.constant 0 : index
    %c0_10 = arith.constant 0 : index
    %c0_11 = arith.constant 0 : index
    %14 = vector.load %arg2[%c0_9, %c0_10, %c0_11] : memref<3x32x32xf32, #tpu.memory_space<vmem>>, vector<1x32x32xf32>
    %15 = vector.shape_cast %14 : vector<1x32x32xf32> to vector<32x32xf32>
    %cst = arith.constant dense<0.000000e+00> : vector<32x384xf32>
    %16 = tpu.matmul %15, %13, %cst {dimension_numbers = #tpu.dot_dimension_numbers<[1], [0], [0], [1], [0, 0, 1, 1], [], []>, precision = #tpu.contract_precision<fp32>} : vector<32x32xf32>, vector<32x384xf32>, vector<32x384xf32> -> vector<32x384xf32>
    %17 = vector.broadcast %3 : vector<32x1xf32> to vector<32x384xf32>
    %18 = arith.addf %16, %17 : vector<32x384xf32>
    %19 = math.tanh %18 : vector<32x384xf32>
    %c1_12 = arith.constant 1 : index
    %c0_13 = arith.constant 0 : index
    %c0_14 = arith.constant 0 : index
    %20 = vector.load %arg2[%c1_12, %c0_13, %c0_14] : memref<3x32x32xf32, #tpu.memory_space<vmem>>, vector<1x32x32xf32>
    %21 = vector.shape_cast %20 : vector<1x32x32xf32> to vector<32x32xf32>
    %cst_15 = arith.constant dense<0.000000e+00> : vector<32x384xf32>
    %22 = tpu.matmul %21, %19, %cst_15 {dimension_numbers = #tpu.dot_dimension_numbers<[1], [0], [0], [1], [0, 0, 1, 1], [], []>, precision = #tpu.contract_precision<fp32>} : vector<32x32xf32>, vector<32x384xf32>, vector<32x384xf32> -> vector<32x384xf32>
    %23 = vector.broadcast %4 : vector<32x1xf32> to vector<32x384xf32>
    %24 = arith.addf %22, %23 : vector<32x384xf32>
    %25 = math.tanh %24 : vector<32x384xf32>
    %c2_16 = arith.constant 2 : index
    %c0_17 = arith.constant 0 : index
    %c0_18 = arith.constant 0 : index
    %26 = vector.load %arg2[%c2_16, %c0_17, %c0_18] : memref<3x32x32xf32, #tpu.memory_space<vmem>>, vector<1x32x32xf32>
    %27 = vector.shape_cast %26 : vector<1x32x32xf32> to vector<32x32xf32>
    %cst_19 = arith.constant dense<0.000000e+00> : vector<32x384xf32>
    %28 = tpu.matmul %27, %25, %cst_19 {dimension_numbers = #tpu.dot_dimension_numbers<[1], [0], [0], [1], [0, 0, 1, 1], [], []>, precision = #tpu.contract_precision<fp32>} : vector<32x32xf32>, vector<32x384xf32>, vector<32x384xf32> -> vector<32x384xf32>
    %29 = vector.broadcast %5 : vector<32x1xf32> to vector<32x384xf32>
    %30 = arith.addf %28, %29 : vector<32x384xf32>
    %31 = math.tanh %30 : vector<32x384xf32>
    %32 = vector.broadcast %6 : vector<32x1xf32> to vector<32x384xf32>
    %33 = arith.mulf %32, %31 : vector<32x384xf32>
    %cst_20 = arith.constant dense<0.000000e+00> : vector<384xf32>
    %34 = vector.multi_reduction <add>, %33, %cst_20 [0] : vector<32x384xf32> to vector<384xf32>
    %35 = vector.shape_cast %34 : vector<384xf32> to vector<1x384xf32>
    %36 = vector.broadcast %7 : vector<1x1xf32> to vector<1x384xf32>
    %37 = arith.addf %35, %36 : vector<1x384xf32>
    %c0_21 = arith.constant 0 : index
    %c0_22 = arith.constant 0 : index
    %38 = vector.load %arg4[%c0_21, %c0_22] : memref<1x384xf32, #tpu.memory_space<vmem>>, vector<1x384xf32>
    tpu.vector_store %arg4[%c0_21, %c0_22], %37 {strides = array<i32>} : memref<1x384xf32, #tpu.memory_space<vmem>>, vector<1x384xf32>,
    return
  }
  func.func @transform_0(%arg0: i32) -> (i32, i32) {
    %c0_i32 = arith.constant 0 : i32
    %c0_i32_0 = arith.constant 0 : i32
    return %c0_i32, %arg0 : i32, i32
  }
  func.func @transform_1(%arg0: i32) -> (i32, i32, i32) {
    %c0_i32 = arith.constant 0 : i32
    %c0_i32_0 = arith.constant 0 : i32
    %c0_i32_1 = arith.constant 0 : i32
    %c0_i32_2 = arith.constant 0 : i32
    return %c0_i32, %c0_i32_0, %c0_i32_1 : i32, i32, i32
  }
  func.func @transform_2(%arg0: i32) -> (i32, i32) {
    %c0_i32 = arith.constant 0 : i32
    %c0_i32_0 = arith.constant 0 : i32
    %c0_i32_1 = arith.constant 0 : i32
    return %c0_i32, %c0_i32_0 : i32, i32
  }
  func.func @transform_3(%arg0: i32) -> (i32, i32) {
    %c0_i32 = arith.constant 0 : i32
    %c0_i32_0 = arith.constant 0 : i32
    return %c0_i32, %arg0 : i32, i32
  }
}

</mosaic_0001>

<bundles_post_ra>
// kernel: _pinn_forward_impl.1
= control target key start
LH: loop header
LB: loop body
LE: loop exit
PB: predicated region body
PF: predicated region fallthrough
CT: control target
= control target key end

     0   :  { %v4782_v0 = vmov 1   ;;  %v4783_v1 = vmov 0   ;;  %v4784_v6 = vmov 0.0   ;;  %v6071_v7 = vlaneseq  ;;  %s6067_s2 = inlined_call_operand.vmem [shape: f32[32,8], index: 2, kind: input, shape index: {}]   ;;  %s6068_s0 = inlined_call_operand.vmem [shape: f32[1,384], index: 0, kind: input, shape index: {}]   ;;  %s6069_s1 = inlined_call_operand.vmem [shape: f32[3,32,32], index: 1, kind: input, shape index: {}]   ;;  %s6070_s3 = inlined_call_operand.vmem [shape: f32[1,384], index: 3, kind: output, shape index: {}]  }
   0x1   :  { %4668 = vset.pattern.permute.xlu1 %v4782_v0  ;;  %4667 = vset.pattern.permute.xlu0 %v4783_v1  ;;  %v4814_v2 = vld [vmem:[%s6067_s2 + $0x18] sm:$0xff]  ;;  %v4821_v3 = vld [vmem:[%s6067_s2 + $0x10] sm:$0xff]  ;;  %v4826_v4 = vld [vmem:[%s6067_s2 + $0x8] sm:$0xff]  ;;  %v4785_v8 = vmov 2   ;;  %vm128_vm0 = vcmask 261120  }
   0x2   :  { %81 = vperm.xlu1 %4668, %v4814_v2   ;;  %37 = vperm.xlu0 %4667, %v4814_v2   ;;  %v4833_v5 = vld [vmem:[%s6067_s2] sm:$0xff]  ;;  %v4842_v9 = vshrl.u32 %v6071_v7, 7  ;;  %v109_v42 = vld [vmem:[%s6069_s1 + $0x8] sm:$0xff]  ;;  %v110_v50 = vld [vmem:[%s6069_s1 + $0x10] sm:$0xff] }
   0x3   :  { %213 = vmatprep.mubr.f32.mxu0 %v4784_v6  ;;  %362 = vmatprep.mubr.f32.mxu1 %v4784_v6  ;;  %v4852_v12 = vld [vmem:[%s6068_s0] sm:$0x7]  ;;  %v133_v48 = vsel %vm128_vm0, %v109_v42, 0  ;;  %v136_v58 = vsel %vm128_vm0, %v110_v50, 0  ;;  %v111_v62 = vld [vmem:[%s6069_s1 + $0x18] sm:$0xff] }
   0x4   :  { %6079 = vst [vmem:[#allocation2_spill] sm:$0xff] %v4842_v9  ;;  %v43_v10 = vsub.s32 0, %v4842_v9  ;;  %v47_v11 = vsub.s32 1, %v4842_v9  ;;  %v108_v33 = vld [vmem:[%s6069_s1] sm:$0xff]  ;;  %v4919_v54 = vand.u32 4294901760, %v133_v48  ;;  %v51_v56 = vsub.s32 2, %v4842_v9 }
   0x5   :  { %v130_v40 = vsel %vm128_vm0, %v108_v33, 0 }
   0x6   :  { %4669 = vset.pattern.permute.xlu1 %v4783_v1  ;;  %32 = vperm.xlu0 %4667, %v4821_v3   ;;  %v44_v13 = vrot.slane %v4852_v12, %v43_v10  ;;  %v48_v14 = vrot.slane %v4852_v12, %v47_v11  ;;  %v4898_v45 = vand.u32 4294901760, %v130_v40  ;;  %v4943_v11 = vsub.f32 %v133_v48, %v4919_v54 }
   0x7   :  { %27 = vperm.xlu1 %4669, %v4826_v4  }
   0x8   :  { %v4916_v52 = vsub.f32 %v130_v40, %v4898_v45 }
   0xa   :  { %4670 = vset.pattern.permute.xlu0 %v4782_v0  ;;  %v4937_v1 = vand.u32 4294901760, %v4916_v52 }
   0xb   :  { %77 = vperm.xlu0 %4670, %v4821_v3   ;;  %22 = vperm.xlu1 %4669, %v4833_v5  }
   0xf   :  { %69 = vperm.xlu0 %4670, %v4833_v5   ;;  %4671 = vset.pattern.permute.xlu1 %v4782_v0 }
  0x10   :  { %73 = vperm.xlu1 %4671, %v4826_v4  }
  0x13   :  { %4673 = vset.pattern.permute.xlu0 %v4785_v8 }
  0x14   :  { %4672 = vset.pattern.permute.xlu1 %v4785_v8  ;;  %121 = vperm.xlu0 %4673, %v4821_v3  }
  0x15   :  { %125 = vperm.xlu1 %4672, %v4814_v2  }
  0x19   :  { %117 = vperm.xlu1 %4672, %v4826_v4  }
  0x1d   :  { %113 = vperm.xlu1 %4672, %v4833_v5  }
  0x7d   :  { %v4857_v15 = vpop.permute.xlu1 %81  ;;  %v4859_v16 = vpop.permute.xlu0 %37 }
  0x7e   :  { %v65_v17 = vmul.f32 %v44_v13, %v4859_v16  ;;  %v66_v18 = vmul.f32 %v48_v14, %v4859_v16 }
  0x80   :  { %v93_v19 = vadd.f32 %v4857_v15, %v65_v17  ;;  %v94_v20 = vadd.f32 %v4857_v15, %v66_v18  ;;  %v4948_v17 = vrot.slane %v4852_v12, %v51_v56 }
  0x81   :  { %v4865_v21 = vpop.permute.xlu0 %32 }
  0x82   :  { %4682 = vtanh.f32 %v93_v19  ;;  %v4867_v22 = vpop.permute.xlu1 %27  ;;  %v62_v23 = vmul.f32 %v44_v13, %v4865_v21  ;;  %v63_v24 = vmul.f32 %v48_v14, %v4865_v21  ;;  %v139_v19 = vsel %vm128_vm0, %v111_v62, 0 }
  0x83   :  { %4684 = vtanh.f32 %v94_v20  ;;  %v59_v31 = vmul.f32 %v44_v13, %v4867_v22  ;;  %v60_v34 = vmul.f32 %v48_v14, %v4867_v22 }
  0x86   :  { %v4871_v25 = vpop.permute.xlu0 %77  ;;  %v4873_v26 = vpop.permute.xlu1 %22 }
  0x87   :  { %v90_v27 = vadd.f32 %v4871_v25, %v62_v23  ;;  %v91_v28 = vadd.f32 %v4871_v25, %v63_v24  ;;  %v56_v29 = vmul.f32 %v44_v13, %v4873_v26  ;;  %v57_v30 = vmul.f32 %v48_v14, %v4873_v26 }
  0x88   :  { %v4945_v13 = vand.u32 4294901760, %v136_v58 }
  0x89   :  { %4686 = vtanh.f32 %v90_v27 }
  0x8a   :  { %4688 = vtanh.f32 %v91_v28  ;;  %v4880_v32 = vpop.permute.xlu0 %69  ;;  %v217_v28 = vsub.f32 %v4916_v52, %v4937_v1  ;;  %v4971_v33 = vsub.f32 %v136_v58, %v4945_v13 }
  0x8b   :  { %v84_v35 = vadd.f32 %v4880_v32, %v56_v29  ;;  %v85_v36 = vadd.f32 %v4880_v32, %v57_v30  ;;  %v4888_v37 = vpop.permute.xlu1 %73 }
  0x8c   :  { %v87_v38 = vadd.f32 %v4888_v37, %v59_v31  ;;  %v88_v39 = vadd.f32 %v4888_v37, %v60_v34  ;;  %v4968_v31 = vand.u32 4294901760, %v4943_v11  ;;  %v4973_v34 = vand.u32 4294901760, %v139_v19 }
  0x8d   :  { %4690 = vtanh.f32 %v84_v35 }
  0x8e   :  { %4692 = vtanh.f32 %v85_v36  ;;  %v67_v36 = vmul.f32 %v4948_v17, %v4859_v16  ;;  %v4994_v16 = vand.u32 4294901760, %v217_v28  ;;  %v5009_v62 = vsub.f32 %v139_v19, %v4973_v34 }
  0x8f   :  { %v4683_v41 = vpop.eup %4682  ;;  %4694 = vtanh.f32 %v87_v38 }
  0x90   :  { %v4685_v43 = vpop.eup %4684  ;;  %v4896_v44 = vand.u32 4294901760, %v4683_v41  ;;  %4696 = vtanh.f32 %v88_v39  ;;  %v95_v58 = vadd.f32 %v4857_v15, %v67_v36 }
  0x91   :  { %v4900_v46 = vand.u32 4294901760, %v4685_v43 }
  0x92   :  { %v4903_v47 = vsub.f32 %v4683_v41, %v4896_v44  ;;  %4698 = vtanh.f32 %v95_v58 }
  0x93   :  { %166 = vmatprep.subr.mxu0 %v4900_v46  ;;  %v4908_v49 = vsub.f32 %v4685_v43, %v4900_v46 }
  0x94   :  { %168 = vmatpush1.msra.mxu0 %v4896_v44  ;;  %v290_v51 = vand.u32 4294901760, %v4903_v47 }
  0x95   :  { %v284_v53 = vand.u32 4294901760, %v4908_v49 }
  0x96   :  { %v4687_v55 = vpop.eup %4686  ;;  %v291_v57 = vsub.f32 %v4903_v47, %v290_v51 }
  0x97   :  { %v4689_v59 = vpop.eup %4688  ;;  %v4926_v60 = vand.u32 4294901760, %v4687_v55  ;;  %v285_v61 = vsub.f32 %v4908_v49, %v284_v53 }
  0x98   :  { %v4934_v63 = vand.u32 4294901760, %v4689_v59  ;;  %v292_v0 = vand.u32 4294901760, %v291_v57 }
  0x99   :  { %v286_v8 = vand.u32 4294901760, %v285_v61  ;;  %v4940_v10 = vsub.f32 %v4687_v55, %v4926_v60  ;;  %v228_v55 = vsub.f32 %v4943_v11, %v4968_v31  ;;  %v5006_v61 = vand.u32 4294901760, %v4971_v33 }
  0x9a   :  { %v4691_v14 = vpop.eup %4690  ;;  %170 = vmatprep.subr.mxu0 %v4934_v63  ;;  %v4952_v18 = vsub.f32 %v4689_v59, %v4934_v63 }
  0x9b   :  { %v4693_v20 = vpop.eup %4692  ;;  %172 = vmatpush1.msra.mxu0 %v4926_v60  ;;  %287 = vmatprep.subr.mxu1 %v286_v8  ;;  %v4956_v23 = vand.u32 4294901760, %v4691_v14  ;;  %v302_v24 = vand.u32 4294901760, %v4940_v10 }
  0x9c   :  { %293 = vmatpush1.msra.mxu1 %v292_v0  ;;  %v4959_v27 = vand.u32 4294901760, %v4693_v20  ;;  %v296_v12 = vand.u32 4294901760, %v4952_v18  ;;  %v4695_v29 = vpop.eup %4694 }
  0x9d   :  { %v303_v30 = vsub.f32 %v4940_v10, %v302_v24  ;;  %v4697_v35 = vpop.eup %4696  ;;  %v4977_v38 = vand.u32 4294901760, %v4695_v29  ;;  %v4988_v43 = vsub.f32 %v4691_v14, %v4956_v23  ;;  %v5020_v14 = vand.u32 4294901760, %v228_v55 }
  0x9e   :  { %v297_v39 = vsub.f32 %v4952_v18, %v296_v12  ;;  %v4983_v40 = vsub.f32 %v4693_v20, %v4959_v27  ;;  %v4985_v41 = vand.u32 4294901760, %v4697_v35  ;;  %v64_v55 = vmul.f32 %v4948_v17, %v4865_v21 }
  0x9f   :  { %v304_v42 = vand.u32 4294901760, %v303_v30  ;;  %v4991_v50 = vsub.f32 %v4695_v29, %v4977_v38  ;;  %v326_v8 = vand.u32 4294901760, %v4988_v43  ;;  %v239_v29 = vsub.f32 %v4971_v33, %v5006_v61 }
  0xa0   :  { %v298_v48 = vand.u32 4294901760, %v297_v39  ;;  %174 = vmatprep.subr.mxu0 %v4985_v41  ;;  %v4999_v56 = vsub.f32 %v4697_v35, %v4985_v41  ;;  %v320_v57 = vand.u32 4294901760, %v4983_v40  ;;  %v5033_v30 = vand.u32 4294901760, %v5009_v62 }
  0xa1   :  { %176 = vmatpush1.msra.mxu0 %v4977_v38  ;;  %v314_v59 = vand.u32 4294901760, %v4991_v50  ;;  %v327_v36 = vsub.f32 %v4988_v43, %v326_v8 }
  0xa2   :  { %299 = vmatprep.subr.mxu1 %v298_v48  ;;  %178 = vmatprep.subr.mxu0 %v4959_v27  ;;  %v308_v0 = vand.u32 4294901760, %v4999_v56  ;;  %v321_v20 = vsub.f32 %v4983_v40, %v320_v57  ;;  %v250_v48 = vsub.f32 %v5009_v62, %v5033_v30 }
  0xa3   :  { %305 = vmatpush1.msra.mxu1 %v304_v42  ;;  %180 = vmatpush1.msra.mxu0 %v4956_v23  ;;  %v315_v15 = vsub.f32 %v4991_v50, %v314_v59  ;;  %v5042_v42 = vand.u32 4294901760, %v239_v29  ;;  %v328_v58 = vand.u32 4294901760, %v327_v36 }
  0xa4   :  { %219 = vmatmul.mubr.f32.vlgmr.msra.gmra.mxu0 %v4994_v16  ;;  %417 = vmatprep.subr.mxu0 %v4908_v49  ;;  %v309_v19 = vsub.f32 %v4999_v56, %v308_v0  ;;  %v322_v39 = vand.u32 4294901760, %v321_v20  ;;  %v5057_v21 = vand.u32 4294901760, %v250_v48  ;;  %v5218_v48 = vpop.permute.xlu1 %125 }
  0xa5   :  { %420 = vmatpush1.msra.mxu0 %v4903_v47  ;;  %224 = vmatprep.mubr.f32.mxu0 %v4784_v6  ;;  %v316_v28 = vand.u32 4294901760, %v315_v15  ;;  %v61_v15 = vmul.f32 %v4948_v17, %v4867_v22  ;;  %v58_v22 = vmul.f32 %v4948_v17, %v4873_v26 }
  0xa6   :  { %423 = vmatprep.subr.mxu0 %v4952_v18  ;;  %v310_v35 = vand.u32 4294901760, %v309_v19  ;;  %v92_v19 = vadd.f32 %v4871_v25, %v64_v55 }
  0xa7   :  { %426 = vmatpush1.msra.mxu0 %v4940_v10  ;;  %v89_v20 = vadd.f32 %v4888_v37, %v61_v15  ;;  %v86_v25 = vadd.f32 %v4880_v32, %v58_v22  ;;  %v4699_v37 = vpop.eup %4698 }
  0xa8   :  { %230 = vmatmul.mubr.f32.gmra.mxu0 %v5020_v14  ;;  %311 = vmatprep.subr.mxu1 %v310_v35  ;;  %4700 = vtanh.f32 %v92_v19  ;;  %v5078_v26 = vand.u32 4294901760, %v4699_v37  ;;  %v5224_v22 = vpop.permute.xlu1 %117 }
  0xa9   :  { %429 = vmatprep.subr.mxu0 %v4999_v56  ;;  %317 = vmatpush1.msra.mxu1 %v316_v28  ;;  %4702 = vtanh.f32 %v89_v20 }
  0xaa   :  { %432 = vmatpush1.msra.mxu0 %v4991_v50  ;;  %323 = vmatprep.subr.mxu1 %v322_v39  ;;  %4704 = vtanh.f32 %v86_v25  ;;  %v5095_v32 = vsub.f32 %v4699_v37, %v5078_v26 }
  0xab   :  { %435 = vmatprep.subr.mxu0 %v4983_v40  ;;  %235 = vmatprep.mubr.f32.mxu0 %v4784_v6 }
  0xac   :  { %329 = vmatpush1.msra.mxu1 %v328_v58  ;;  %438 = vmatpush1.msra.mxu0 %v4988_v43  ;;  %v5108_v47 = vand.u32 4294901760, %v5095_v32 }
  0xad   :  { %241 = vmatmul.mubr.f32.gmra.mxu0 %v5042_v42  ;;  %364 = vmatmul.mubr.f32.vlgmr.msra.gmra.mxu1 %v4898_v45 }
  0xae   :  { %529 = vmatprep.subr.mxu1 %v4900_v46  ;;  %640 = vmatprep.subr.mxu0 %v284_v53  ;;  %v968_v53 = vsub.f32 %v5095_v32, %v5108_v47 }
  0xaf   :  { %531 = vmatpush1.msra.mxu1 %v4896_v44  ;;  %246 = vmatprep.mubr.f32.mxu0 %v4784_v6 }
  0xb0   :  { %533 = vmatprep.subr.mxu1 %v4934_v63  ;;  %369 = vmatprep.mubr.f32.mxu1 %v4784_v6  ;;  %v969_v18 = vand.u32 4294901760, %v968_v53  ;;  %v5231_v53 = vpop.permute.xlu1 %113 }
  0xb1   :  { %535 = vmatpush1.msra.mxu1 %v4926_v60  ;;  %252 = vmatmul.mubr.f32.gmra.mxu0 %v5057_v21 }
  0xb2   :  { %371 = vmatmul.mubr.f32.gmra.mxu1 %v4919_v54  ;;  %537 = vmatprep.subr.mxu1 %v4985_v41 }
  0xb3   :  { %539 = vmatpush1.msra.mxu1 %v4977_v38  ;;  %376 = vmatprep.mubr.f32.mxu1 %v4784_v6 }
  0xb4   :  { %541 = vmatprep.subr.mxu1 %v4959_v27  ;;  %471 = vmatprep.mubr.f32.mxu0 %v4784_v6 }
  0xb5   :  { %543 = vmatpush1.msra.mxu1 %v4956_v23  ;;  %474 = vmatmul.mubr.f32.vlgmr.msra.gmra.mxu0 %v4916_v52 }
  0xb6   :  { %378 = vmatmul.mubr.f32.gmra.mxu1 %v4945_v13  ;;  %644 = vmatpush1.msra.mxu0 %v290_v51 }
  0xb7   :  { %755 = vmatprep.subr.mxu1 %v4900_v46  ;;  %648 = vmatprep.subr.mxu0 %v296_v12  ;;  %v4701_v46 = vpop.eup %4700 }
  0xb8   :  { %652 = vmatpush1.msra.mxu0 %v302_v24  ;;  %383 = vmatprep.mubr.f32.mxu1 %v4784_v6  ;;  %v4703_v49 = vpop.eup %4702  ;;  %v5114_v51 = vand.u32 4294901760, %v4701_v46 }
  0xb9   :  { %479 = vmatprep.mubr.f32.mxu0 %v4784_v6  ;;  %656 = vmatprep.subr.mxu0 %v308_v0  ;;  %v4705_v10 = vpop.eup %4704  ;;  %v5121_v17 = vand.u32 4294901760, %v4703_v49 }
  0xba   :  { %385 = vmatmul.mubr.f32.gmra.mxu1 %v4973_v34  ;;  %482 = vmatmul.mubr.f32.gmra.mxu0 %v4943_v11 }
  0xbb   :  { %660 = vmatpush1.msra.mxu0 %v314_v59  ;;  %487 = vmatprep.mubr.f32.mxu0 %v4784_v6 }
  0xbc   :  { %664 = vmatprep.subr.mxu0 %v320_v57  ;;  %576 = vmatprep.mubr.f32.mxu1 %v4784_v6 }
  0xbd   :  { %668 = vmatpush1.msra.mxu0 %v326_v8 }
  0xbe   :  { %4406 = vmatprep.subr.mxu0 %v5078_v26  ;;  %490 = vmatmul.mubr.f32.gmra.mxu0 %v4971_v33 }
  0xbf   :  { %580 = vmatmul.mubr.f32.vlgmr.msra.gmra.mxu1 %v4937_v1  ;;  %495 = vmatprep.mubr.f32.mxu0 %v4784_v6 }
  0xc0   :  { %757 = vmatpush1.msra.mxu1 %v4896_v44  ;;  %585 = vmatprep.mubr.f32.mxu1 %v4784_v6  ;;  %v973_v44 = vsub.f32 %v4701_v46, %v5114_v51 }
  0xc1   :  { %759 = vmatprep.subr.mxu1 %v4934_v63  ;;  %v5130_v63 = vand.u32 4294901760, %v4705_v10 }
  0xc2   :  { %761 = vmatpush1.msra.mxu1 %v4926_v60  ;;  %498 = vmatmul.mubr.f32.gmra.mxu0 %v5009_v62  ;;  %v980_v60 = vsub.f32 %v4703_v49, %v5121_v17  ;;  %v974_v24 = vand.u32 4294901760, %v973_v44 }
  0xc3   :  { %763 = vmatprep.subr.mxu1 %v4985_v41  ;;  %589 = vmatmul.mubr.f32.gmra.mxu1 %v4968_v31 }
  0xc4   :  { %765 = vmatpush1.msra.mxu1 %v4977_v38  ;;  %594 = vmatprep.mubr.f32.mxu1 %v4784_v6  ;;  %v975_v12 = vsub.f32 %v973_v44, %v974_v24 }
  0xc5   :  { %767 = vmatprep.subr.mxu1 %v4959_v27  ;;  %701 = vmatprep.mubr.f32.mxu0 %v4784_v6  ;;  %v987_v27 = vsub.f32 %v4705_v10, %v5130_v63 }
  0xc6   :  { %769 = vmatpush1.msra.mxu1 %v4956_v23  ;;  %703 = vmatmul.mubr.f32.vlgmr.msra.gmra.mxu0 %v4898_v45  ;;  %v981_v23 = vand.u32 4294901760, %v980_v60  ;;  %v976_v41 = vand.u32 4294901760, %v975_v12 }
  0xc7   :  { %4420 = vmatprep.subr.mxu1 %v969_v18  ;;  %598 = vmatmul.mubr.f32.gmra.mxu1 %v5006_v61  ;;  %v988_v38 = vand.u32 4294901760, %v987_v27 }
  0xc8   :  { %4407 = vmatpush3.msra.mxu0 %v5078_v26  ;;  %603 = vmatprep.mubr.f32.mxu1 %v4784_v6  ;;  %v982_v40 = vsub.f32 %v980_v60, %v981_v23 }
  0xc9   :  { %4408 = vmatprep.subr.mxu0 %v5114_v51  ;;  %708 = vmatprep.mubr.f32.mxu0 %v4784_v6  ;;  %v989_v43 = vsub.f32 %v987_v27, %v988_v38 }
  0xca   :  { %4409 = vmatpush3.msra.mxu0 %v5114_v51  ;;  %v983_v50 = vand.u32 4294901760, %v982_v40 }
  0xcb   :  { %4410 = vmatprep.subr.mxu0 %v5121_v17  ;;  %607 = vmatmul.mubr.f32.gmra.mxu1 %v5033_v30  ;;  %v990_v56 = vand.u32 4294901760, %v989_v43 }
  0xcc   :  { %710 = vmatmul.mubr.f32.gmra.mxu0 %v4919_v54  ;;  %802 = vmatprep.mubr.f32.mxu1 %v4784_v6 }
  0xcd   :  { %4411 = vmatpush3.msra.mxu0 %v5121_v17  ;;  %715 = vmatprep.mubr.f32.mxu0 %v4784_v6 }
  0xce   :  { %4412 = vmatprep.subr.mxu0 %v5130_v63 }
  0xcf   :  { %4413 = vmatpush3.msra.mxu0 %v5130_v63  ;;  %804 = vmatmul.mubr.f32.vlgmr.msra.gmra.mxu1 %v4898_v45 }
  0xd0   :  { %4434 = vmatprep.subr.mxu0 %v5095_v32  ;;  %717 = vmatmul.mubr.f32.gmra.mxu0 %v4945_v13 }
  0xd1   :  { %4421 = vmatpush3.msra.mxu1 %v969_v18  ;;  %722 = vmatprep.mubr.f32.mxu0 %v4784_v6 }
  0xd2   :  { %4422 = vmatprep.subr.mxu1 %v976_v41  ;;  %809 = vmatprep.mubr.f32.mxu1 %v4784_v6 }
  0xd3   :  { %4423 = vmatpush3.msra.mxu1 %v976_v41 }
  0xd4   :  { %4424 = vmatprep.subr.mxu1 %v983_v50  ;;  %724 = vmatmul.mubr.f32.gmra.mxu0 %v4973_v34 }
  0xd5   :  { %811 = vmatmul.mubr.f32.gmra.mxu1 %v4919_v54  ;;  %4414 = vmatprep.mubr.f32.mxu0 %v4994_v16 }
  0xd6   :  { %4425 = vmatpush3.msra.mxu1 %v983_v50  ;;  %816 = vmatprep.mubr.f32.mxu1 %v4784_v6 }
  0xd7   :  { %4426 = vmatprep.subr.mxu1 %v990_v56 }
  0xd8   :  { %4427 = vmatpush3.msra.mxu1 %v990_v56  ;;  %4415 = vmatmul.mubr.f32.vlgmr.msra.gmra.mxu0 %v5020_v14 }
  0xd9   :  { %4448 = vmatprep.subr.mxu1 %v5078_v26  ;;  %818 = vmatmul.mubr.f32.gmra.mxu1 %v4945_v13 }
  0xda   :  { %4435 = vmatpush3.msra.mxu0 %v5095_v32  ;;  %823 = vmatprep.mubr.f32.mxu1 %v4784_v6  ;;  %v5227_v32 = vpop.permute.xlu0 %121 }
  0xdb   :  { %4436 = vmatprep.subr.mxu0 %v973_v44  ;;  %4417 = vmatprep.mubr.f32.mxu0 %v5042_v42 }
  0xdc   :  { %4437 = vmatpush3.msra.mxu0 %v973_v44 }
  0xdd   :  { %4438 = vmatprep.subr.mxu0 %v980_v60  ;;  %825 = vmatmul.mubr.f32.gmra.mxu1 %v4973_v34 }
  0xde   :  { %4418 = vmatmul.mubr.f32.gmra.mxu0 %v5057_v21  ;;  %4428 = vmatprep.mubr.f32.mxu1 %v4898_v45 }
  0xdf   :  { %4439 = vmatpush3.msra.mxu0 %v980_v60  ;;  %4442 = vmatprep.mubr.f32.mxu0 %v4916_v52 }
  0xe0   :  { %4440 = vmatprep.subr.mxu0 %v987_v27 }
  0xe1   :  { %4441 = vmatpush3.msra.mxu0 %v987_v27  ;;  %4429 = vmatmul.mubr.f32.vlgmr.msra.gmra.mxu1 %v4919_v54 }
  0xe2   :  { %4462 = vmatprep.subr.mxu0 %v5108_v47  ;;  %4443 = vmatmul.mubr.f32.vlgmr.msra.gmra.mxu0 %v4943_v11 }
  0xe3   :  { %4449 = vmatpush3.msra.mxu1 %v5078_v26  ;;  %4463 = vmatpush3.msra.mxu0 %v5108_v47  ;;  %v4786_v47 = vmov 3  }
  0xe4   :  { %4450 = vmatprep.subr.mxu1 %v5114_v51  ;;  %4464 = vmatprep.subr.mxu0 %v974_v24 }
  0xe5   :  { %4451 = vmatpush3.msra.mxu1 %v5114_v51  ;;  %4465 = vmatpush3.msra.mxu0 %v974_v24 }
  0xe6   :  { %4431 = vmatprep.mubr.f32.mxu1 %v4945_v13  ;;  %4452 = vmatprep.subr.mxu1 %v5121_v17 }
  0xe7   :  { %4466 = vmatprep.subr.mxu0 %v981_v23  ;;  %4432 = vmatmul.mubr.f32.gmra.mxu1 %v4973_v34 }
  0xe8   :  { %4453 = vmatpush3.msra.mxu1 %v5121_v17  ;;  %4467 = vmatpush3.msra.mxu0 %v981_v23 }
  0xe9   :  { %4445 = vmatprep.mubr.f32.mxu0 %v4971_v33  ;;  %4454 = vmatprep.subr.mxu1 %v5130_v63 }
  0xea   :  { %4468 = vmatprep.subr.mxu0 %v988_v38  ;;  %4446 = vmatmul.mubr.f32.gmra.mxu0 %v5009_v62 }
  0xeb   :  { %4455 = vmatpush3.msra.mxu1 %v5130_v63  ;;  %4469 = vmatpush3.msra.mxu0 %v988_v38 }
  0xec   :  { %4456 = vmatprep.mubr.f32.mxu1 %v4937_v1  ;;  %4476 = vmatprep.subr.mxu1 %v5078_v26 }
  0xed   :  { %4457 = vmatmul.mubr.f32.vlgmr.msra.gmra.mxu1 %v4968_v31  ;;  %4470 = vmatprep.mubr.f32.mxu0 %v4898_v45 }
  0xee   :  { %4477 = vmatpush3.msra.mxu1 %v5078_v26  ;;  %4471 = vmatmul.mubr.f32.vlgmr.msra.gmra.mxu0 %v4919_v54 }
  0xef   :  { %4478 = vmatprep.subr.mxu1 %v5114_v51  ;;  %4459 = vmatprep.mubr.f32.mxu1 %v5006_v61 }
  0xf0   :  { %4479 = vmatpush3.msra.mxu1 %v5114_v51  ;;  %4473 = vmatprep.mubr.f32.mxu0 %v4945_v13 }
  0xf1   :  { %4480 = vmatprep.subr.mxu1 %v5121_v17  ;;  %4460 = vmatmul.mubr.f32.gmra.mxu1 %v5033_v30 }
  0xf2   :  { %4481 = vmatpush3.msra.mxu1 %v5121_v17  ;;  %4474 = vmatmul.mubr.f32.gmra.mxu0 %v4973_v34 }
  0xf3   :  { %4482 = vmatprep.subr.mxu1 %v5130_v63  ;;  %4484 = vmatprep.mubr.f32.mxu1 %v4898_v45 }
  0xf4   :  { %4483 = vmatpush3.msra.mxu1 %v5130_v63  ;;  %1562 = vmatprep.mubr.f32.mxu0 %v4784_v6 }
  0xf5   :  { %4485 = vmatmul.mubr.f32.vlgmr.msra.gmra.mxu1 %v4919_v54  ;;  %4674 = vset.pattern.permute.xlu0 %v4786_v47 }
  0xf6   :  { %4487 = vmatprep.mubr.f32.mxu1 %v4945_v13  ;;  %4675 = vset.pattern.permute.xlu1 %v4786_v47 }
  0xf7   :  { %1475 = vperm.xlu0 %4674, %v4814_v2   ;;  %1471 = vperm.xlu1 %4675, %v4821_v3  }
  0xf9   :  { %4488 = vmatmul.mubr.f32.gmra.mxu1 %v4973_v34 }
  0xfa   :  { %1711 = vmatprep.mubr.f32.mxu1 %v4784_v6 }
  0xfb   :  { %1463 = vperm.xlu0 %4674, %v4833_v5   ;;  %1467 = vperm.xlu1 %4675, %v4826_v4  }
 0x164   :  { %v220_v52 = vpop.f32.mrf.mxu0 }
 0x165   :  { %v221_v24 = vadd.f32 %v220_v52, %v5231_v53 }
 0x166   :  { %v222_v1 = vpop.f32.mrf.mxu0 }
 0x167   :  { %v223_v2 = vadd.f32 %v222_v1, %v5231_v53 }
 0x168   :  { %v231_v11 = vpop.f32.mrf.mxu0 }
 0x169   :  { %v232_v26 = vadd.f32 %v231_v11, %v5224_v22 }
 0x16a   :  { %v233_v31 = vpop.f32.mrf.mxu0 }
 0x16b   :  { %v234_v44 = vadd.f32 %v233_v31, %v5224_v22 }
 0x16d   :  { %v242_v33 = vpop.f32.mrf.mxu0  ;;  %v5208_v16 = vpop.f32.mrf.mxu1 }
 0x16e   :  { %v243_v10 = vadd.f32 %v242_v33, %v5227_v32  ;;  %v366_v4 = vadd.f32 %v5208_v16, %v221_v24 }
 0x16f   :  { %v244_v45 = vpop.f32.mrf.mxu0  ;;  %v367_v57 = vpop.f32.mrf.mxu1 }
 0x170   :  { %v245_v40 = vadd.f32 %v244_v45, %v5227_v32  ;;  %v368_v43 = vadd.f32 %v367_v57, %v223_v2 }
 0x171   :  { %v253_v59 = vpop.f32.mrf.mxu0 }
 0x172   :  { %v372_v61 = vpop.f32.mrf.mxu1  ;;  %v254_v12 = vadd.f32 %v253_v59, %v5218_v48 }
 0x173   :  { %v5210_v62 = vpop.f32.mrf.mxu0  ;;  %v373_v63 = vadd.f32 %v372_v61, %v232_v26 }
 0x174   :  { %v374_v54 = vpop.f32.mrf.mxu1 }
 0x175   :  { %v5212_v0 = vpop.f32.mrf.mxu0  ;;  %v375_v3 = vadd.f32 %v374_v54, %v234_v44  ;;  %v256_v54 = vadd.f32 %v5210_v62, %v5218_v48 }
 0x176   :  { %v379_v13 = vpop.f32.mrf.mxu1  ;;  %v476_v57 = vadd.f32 %v5212_v0, %v366_v4 }
 0x177   :  { %v477_v34 = vpop.f32.mrf.mxu0  ;;  %v380_v38 = vadd.f32 %v379_v13, %v243_v10 }
 0x178   :  { %v381_v8 = vpop.f32.mrf.mxu1  ;;  %v478_v52 = vadd.f32 %v477_v34, %v368_v43 }
 0x179   :  { %v382_v11 = vadd.f32 %v381_v8, %v245_v40 }
 0x17a   :  { %v386_v14 = vpop.f32.mrf.mxu1  ;;  %v483_v28 = vpop.f32.mrf.mxu0 }
 0x17b   :  { %v484_v27 = vadd.f32 %v483_v28, %v373_v63  ;;  %v387_v59 = vadd.f32 %v386_v14, %v254_v12 }
 0x17c   :  { %v5214_v29 = vpop.f32.mrf.mxu1  ;;  %v485_v30 = vpop.f32.mrf.mxu0 }
 0x17d   :  { %v486_v50 = vadd.f32 %v485_v30, %v375_v3  ;;  %v389_v26 = vadd.f32 %v5214_v29, %v256_v54 }
 0x17e   :  { %v491_v35 = vpop.f32.mrf.mxu0 }
 0x17f   :  { %v5216_v36 = vpop.f32.mrf.mxu1  ;;  %v492_v5 = vadd.f32 %v491_v35, %v380_v38 }
 0x180   :  { %v493_v39 = vpop.f32.mrf.mxu0 }
 0x181   :  { %v583_v42 = vpop.f32.mrf.mxu1  ;;  %v494_v13 = vadd.f32 %v493_v39, %v382_v11 }
 0x182   :  { %v499_v55 = vpop.f32.mrf.mxu0  ;;  %v584_v30 = vadd.f32 %v583_v42, %v478_v52  ;;  %v4256_v52 = vld [vmem:[%s6069_s1 + $0x30] sm:$0xff] }
 0x183   :  { %v590_v58 = vpop.f32.mrf.mxu1  ;;  %v500_v16 = vadd.f32 %v499_v55, %v387_v59 }
 0x184   :  { %v5220_v15 = vpop.f32.mrf.mxu0  ;;  %v591_v56 = vadd.f32 %v590_v58, %v484_v27 }
 0x185   :  { %v592_v19 = vpop.f32.mrf.mxu1 }
 0x186   :  { %v5222_v21 = vpop.f32.mrf.mxu0  ;;  %v593_v33 = vadd.f32 %v592_v19, %v486_v50 }
 0x187   :  { %v599_v20 = vpop.f32.mrf.mxu1 }
 0x188   :  { %v706_v25 = vpop.f32.mrf.mxu0  ;;  %v600_v28 = vadd.f32 %v599_v20, %v492_v5  ;;  %v502_v20 = vadd.f32 %v5220_v15, %v389_v26  ;;  %v4254_v15 = vld [vmem:[%s6069_s1 + $0x20] sm:$0xff] }
 0x189   :  { %v601_v37 = vpop.f32.mrf.mxu1  ;;  %v707_v62 = vadd.f32 %v706_v25, %v584_v30 }
 0x18a   :  { %v602_v34 = vadd.f32 %v601_v37, %v494_v13 }
 0x18b   :  { %v608_v46 = vpop.f32.mrf.mxu1 }
 0x18c   :  { %v711_v49 = vpop.f32.mrf.mxu0  ;;  %v609_v10 = vadd.f32 %v608_v46, %v500_v16 }
 0x18d   :  { %v610_v51 = vpop.f32.mrf.mxu1  ;;  %v712_v1 = vadd.f32 %v711_v49, %v591_v56  ;;  %v582_v49 = vadd.f32 %v5216_v36, %v476_v57 }
 0x18e   :  { %v713_v17 = vpop.f32.mrf.mxu0  ;;  %v611_v37 = vadd.f32 %v610_v51, %v502_v20  ;;  %v1479_v51 = vsel %vm128_vm0, %v4254_v15, 0 }
 0x18f   :  { %v805_v18 = vpop.f32.mrf.mxu1  ;;  %v714_v58 = vadd.f32 %v713_v17, %v593_v33  ;;  %v705_v44 = vadd.f32 %v5222_v21, %v582_v49  ;;  %v5268_v40 = vand.u32 4294901760, %v1479_v51 }
 0x190   :  { %v718_v60 = vpop.f32.mrf.mxu0 }
 0x191   :  { %v807_v23 = vpop.f32.mrf.mxu1  ;;  %v719_v19 = vadd.f32 %v718_v60, %v600_v28  ;;  %v806_v36 = vadd.f32 %v805_v18, %v705_v44  ;;  %v5274_v56 = vsub.f32 %v1479_v51, %v5268_v40 }
 0x192   :  { %v720_v41 = vpop.f32.mrf.mxu0  ;;  %v808_v29 = vadd.f32 %v807_v23, %v707_v62  ;;  %v4255_v23 = vld [vmem:[%s6069_s1 + $0x28] sm:$0xff] }
 0x193   :  { %v721_v0 = vadd.f32 %v720_v41, %v602_v34  ;;  %v1482_v41 = vsel %vm128_vm0, %v4255_v23, 0  ;;  %v5284_v54 = vand.u32 4294901760, %v5274_v56 }
 0x194   :  { %v725_v31 = vpop.f32.mrf.mxu0  ;;  %v5276_v11 = vand.u32 4294901760, %v1482_v41 }
 0x195   :  { %v812_v61 = vpop.f32.mrf.mxu1  ;;  %v726_v63 = vadd.f32 %v725_v31, %v609_v10 }
 0x196   :  { %v727_v45 = vpop.f32.mrf.mxu0  ;;  %v813_v8 = vadd.f32 %v812_v61, %v712_v1  ;;  %v5287_v59 = vsub.f32 %v1482_v41, %v5276_v11 }
 0x197   :  { %v814_v35 = vpop.f32.mrf.mxu1  ;;  %v728_v46 = vadd.f32 %v727_v45, %v611_v37 }
 0x198   :  { %v5246_v47 = vpop.f32.mrf.mxu0  ;;  %v815_v14 = vadd.f32 %v814_v35, %v714_v58  ;;  %4706 = vtanh.f32 %v813_v8  ;;  %v1485_v58 = vsel %vm128_vm0, %v4256_v52, 0  ;;  %v5330_v37 = vand.u32 4294901760, %v5287_v59 }
 0x199   :  { %v819_v39 = vpop.f32.mrf.mxu1 }
 0x19a   :  { %v820_v42 = vadd.f32 %v819_v39, %v719_v19  ;;  %v5250_v17 = vpop.f32.mrf.mxu0 }
 0x19b   :  { %v821_v55 = vpop.f32.mrf.mxu1 }
 0x19c   :  { %4708 = vtanh.f32 %v820_v42  ;;  %v822_v60 = vadd.f32 %v821_v55, %v721_v0  ;;  %v1566_v0 = vsub.f32 %v5274_v56, %v5284_v54  ;;  %v5319_v42 = vand.u32 4294901760, %v1485_v58 }
 0x19d   :  { %4710 = vtanh.f32 %v815_v14  ;;  %v826_v25 = vpop.f32.mrf.mxu1  ;;  %v4257_v14 = vld [vmem:[%s6069_s1 + $0x38] sm:$0xff] }
 0x19e   :  { %4712 = vtanh.f32 %v822_v60  ;;  %v827_v24 = vadd.f32 %v826_v25, %v726_v63  ;;  %v4419_v2 = vpop.f32.mrf.mxu0  ;;  %v5350_v23 = vand.u32 4294901760, %v1566_v0 }
 0x19f   :  { %4714 = vtanh.f32 %v808_v29  ;;  %v828_v21 = vpop.f32.mrf.mxu1  ;;  %v937_v28 = vadd.f32 %v4419_v2, %v5218_v48 }
 0x1a0   :  { %4716 = vtanh.f32 %v827_v24  ;;  %v829_v3 = vadd.f32 %v828_v21, %v728_v46  ;;  %v5256_v27 = vpop.f32.mrf.mxu0  ;;  %v1488_v46 = vsel %vm128_vm0, %v4257_v14, 0 }
 0x1a1   :  { %4718 = vtanh.f32 %v806_v36  ;;  %v5259_v18 = vpop.f32.mrf.mxu1 }
 0x1a2   :  { %4720 = vtanh.f32 %v829_v3  ;;  %v5264_v12 = vpop.f32.mrf.mxu0 }
 0x1a3   :  { %v5266_v38 = vpop.f32.mrf.mxu1 }
 0x1a4   :  { %v5271_v43 = vpop.f32.mrf.mxu0 }
 0x1a5   :  { %v4707_v5 = vpop.eup %4706 }
 0x1a6   :  { %v5301_v16 = vand.u32 4294901760, %v4707_v5 }
 0x1a7   :  { %v4433_v50 = vpop.f32.mrf.mxu1 }
 0x1a8   :  { %v1046_v19 = vadd.f32 %v4433_v50, %v937_v28  ;;  %v5340_v15 = vsub.f32 %v4707_v5, %v5301_v16  ;;  %v5356_v50 = vsub.f32 %v1485_v58, %v5319_v42 }
 0x1a9   :  { %v4709_v31 = vpop.eup %4708  ;;  %v5278_v4 = vpop.f32.mrf.mxu1 }
 0x1aa   :  { %v4711_v33 = vpop.eup %4710  ;;  %v4447_v1 = vpop.f32.mrf.mxu0  ;;  %v5294_v30 = vand.u32 4294901760, %v4709_v31  ;;  %v1663_v14 = vand.u32 4294901760, %v5340_v15 }
 0x1ab   :  { %v4713_v61 = vpop.eup %4712  ;;  %v5299_v26 = vand.u32 4294901760, %v4711_v33  ;;  %v1147_v24 = vadd.f32 %v4447_v1, %v1046_v19  ;;  %v927_v1 = vadd.f32 %v5256_v27, %v5227_v32  ;;  %v1577_v19 = vsub.f32 %v5287_v59, %v5330_v37 }
 0x1ac   :  { %v4715_v13 = vpop.eup %4714  ;;  %v5290_v45 = vpop.f32.mrf.mxu0  ;;  %v5292_v57 = vand.u32 4294901760, %v4713_v61  ;;  %v5327_v55 = vsub.f32 %v4709_v31, %v5294_v30 }
 0x1ad   :  { %v4717_v8 = vpop.eup %4716  ;;  %v5297_v35 = vpop.f32.mrf.mxu1  ;;  %v5315_v10 = vand.u32 4294901760, %v4715_v13  ;;  %v5337_v25 = vsub.f32 %v4711_v33, %v5299_v26  ;;  %v5361_v33 = vand.u32 4294901760, %v1488_v46 }
 0x1ae   :  { %v4719_v34 = vpop.eup %4718  ;;  %v5303_v49 = vpop.f32.mrf.mxu0  ;;  %v5305_v48 = vand.u32 4294901760, %v4717_v8  ;;  %v5308_v62 = vsub.f32 %v4713_v61, %v5292_v57  ;;  %v1651_v52 = vand.u32 4294901760, %v5327_v55 }
 0x1af   :  { %v4721_v39 = vpop.eup %4720  ;;  %v5313_v20 = vpop.f32.mrf.mxu1  ;;  %v5334_v36 = vand.u32 4294901760, %v4719_v34  ;;  %v5353_v41 = vsub.f32 %v4715_v13, %v5315_v10  ;;  %v1657_v58 = vand.u32 4294901760, %v5337_v25 }
 0x1b0   :  { %v5321_v44 = vand.u32 4294901760, %v4721_v39  ;;  %v5324_v29 = vsub.f32 %v4717_v8, %v5305_v48  ;;  %v5332_v60 = vpop.f32.mrf.mxu0  ;;  %v6072_v3 = vand.u32 4294901760, %v5308_v62 }
 0x1b1   :  { %v4461_v63 = vpop.f32.mrf.mxu1  ;;  %v5373_v8 = vsub.f32 %v4719_v34, %v5334_v36  ;;  %v1040_v34 = vadd.f32 %v5278_v4, %v927_v1 }
 0x1b2   :  { %1515 = vmatprep.subr.mxu0 %v5321_v44  ;;  %v5345_v2 = vsub.f32 %v4721_v39, %v5321_v44  ;;  %v6073_v21 = vand.u32 4294901760, %v5324_v29  ;;  %v1248_v5 = vadd.f32 %v4461_v63, %v1147_v24  ;;  %v4475_v61 = vpop.f32.mrf.mxu0  ;;  %v1646_v27 = vsub.f32 %v5308_v62, %v6072_v3 }
 0x1b3   :  { %v1239_v51 = vpop.f32.mrf.mxu1  ;;  %1517 = vmatpush1.msra.mxu0 %v5305_v48  ;;  %v917_v39 = vadd.f32 %v5246_v47, %v5224_v22  ;;  %v1669_v63 = vand.u32 4294901760, %v5353_v41  ;;  %v5393_v24 = vand.u32 4294901760, %v5356_v50  ;;  %v5400_v22 = vsub.f32 %v1488_v46, %v5361_v33 }
 0x1b4   :  { %1519 = vmatprep.subr.mxu0 %v5292_v57  ;;  %v6074_v31 = vand.u32 4294901760, %v5345_v2  ;;  %v1640_v13 = vsub.f32 %v5324_v29, %v6073_v21  ;;  %v1349_v7 = vadd.f32 %v4475_v61, %v1248_v5  ;;  %v1652_v21 = vsub.f32 %v5327_v55, %v1651_v52 }
 0x1b5   :  { %v5365_v28 = vpop.f32.mrf.mxu1  ;;  %1521 = vmatpush1.msra.mxu0 %v5294_v30  ;;  %v1034_v47 = vadd.f32 %v5259_v18, %v917_v39  ;;  %v1658_v5 = vsub.f32 %v5337_v25, %v1657_v58  ;;  %v1675_v61 = vand.u32 4294901760, %v5373_v8  ;;  %v1647_v46 = vand.u32 4294901760, %v1646_v27 }
 0x1b6   :  { %1523 = vmatprep.subr.mxu0 %v5299_v26  ;;  %v1634_v32 = vsub.f32 %v5345_v2, %v6074_v31  ;;  %v1641_v1 = vand.u32 4294901760, %v1640_v13  ;;  %v1664_v18 = vsub.f32 %v5340_v15, %v1663_v14  ;;  %v1140_v13 = vadd.f32 %v5290_v45, %v1040_v34 }
 0x1b7   :  { %v5388_v0 = vpop.f32.mrf.mxu1  ;;  %1525 = vmatpush1.msra.mxu0 %v5301_v16  ;;  %v5416_v39 = vand.u32 4294901760, %v1577_v19  ;;  %v5426_v45 = vand.u32 4294901760, %v5400_v22  ;;  %v1133_v27 = vadd.f32 %v5264_v12, %v1034_v47  ;;  %v1659_v34 = vand.u32 4294901760, %v1658_v5 }
 0x1b8   :  { %1527 = vmatprep.subr.mxu0 %v5315_v10  ;;  %v1635_v3 = vand.u32 4294901760, %v1634_v32  ;;  %v907_v32 = vadd.f32 %v5250_v17, %v5231_v53  ;;  %v1670_v53 = vsub.f32 %v5353_v41, %v1669_v63  ;;  %v1240_v19 = vadd.f32 %v1239_v51, %v1140_v13 }
 0x1b9   :  { %v4489_v4 = vpop.f32.mrf.mxu1  ;;  %1529 = vmatpush1.msra.mxu0 %v5334_v36  ;;  %v1599_v5 = vsub.f32 %v5400_v22, %v5426_v45 }
 0x1ba   :  { %v1442_v31 = vadd.f32 %v4489_v4, %v1349_v7  ;;  %1568 = vmatmul.mubr.f32.vlgmr.msra.gmra.mxu0 %v5350_v23  ;;  %1636 = vmatprep.subr.mxu1 %v1635_v3  ;;  %v1588_v7 = vsub.f32 %v5356_v50, %v5393_v24  ;;  %v1028_v17 = vadd.f32 %v5266_v38, %v907_v32  ;;  %v1653_v3 = vand.u32 4294901760, %v1652_v21 }
 0x1bb   :  { %1766 = vmatprep.subr.mxu0 %v5345_v2  ;;  %1642 = vmatpush1.msra.mxu1 %v1641_v1  ;;  %v1676_v38 = vsub.f32 %v5373_v8, %v1675_v61  ;;  %v1665_v21 = vand.u32 4294901760, %v1664_v18  ;;  %v1232_v4 = vadd.f32 %v5297_v35, %v1133_v27  ;;  %v1671_v12 = vand.u32 4294901760, %v1670_v53  ;;  %v1435_v47 = vpop.f32.mrf.mxu1 }
 0x1bc   :  { %4722 = vtanh.f32 %v1442_v31  ;;  %1769 = vmatpush1.msra.mxu0 %v5324_v29  ;;  %1648 = vmatprep.subr.mxu1 %v1647_v46  ;;  %v1342_v31 = vpop.f32.mrf.mxu0  ;;  %v1126_v51 = vadd.f32 %v5271_v43, %v1028_v17  ;;  %v5439_v1 = vand.u32 4294901760, %v1588_v7  ;;  %v5451_v13 = vand.u32 4294901760, %v1599_v5 }
 0x1bd   :  { %1772 = vmatprep.subr.mxu0 %v5308_v62  ;;  %1573 = vmatprep.mubr.f32.mxu0 %v4784_v6  ;;  %v1343_v32 = vadd.f32 %v1342_v31, %v1240_v19  ;;  %v1677_v35 = vand.u32 4294901760, %v1676_v38  ;;  %v1337_v43 = vadd.f32 %v5303_v49, %v1232_v4 }
 0x1be   :  { %1654 = vmatpush1.msra.mxu1 %v1653_v3  ;;  %1775 = vmatpush1.msra.mxu0 %v5327_v55  ;;  %v1224_v46 = vadd.f32 %v5313_v20, %v1126_v51  ;;  %v6080_v20 = vand.u32 4294901760, %v5345_v2  ;;  %v6081_v2 = vand.u32 4294901760, %v5324_v29 }
 0x1bf   :  { %1579 = vmatmul.mubr.f32.gmra.mxu0 %v5416_v39  ;;  %1660 = vmatprep.subr.mxu1 %v1659_v34  ;;  %v1436_v18 = vadd.f32 %v1435_v47, %v1343_v32  ;;  %v1430_v53 = vadd.f32 %v5365_v28, %v1337_v43 }
 0x1c0   :  { %1778 = vmatprep.subr.mxu0 %v5337_v25  ;;  %1666 = vmatpush1.msra.mxu1 %v1665_v21  ;;  %v1331_v7 = vadd.f32 %v5332_v60, %v1224_v46 }
 0x1c1   :  { %1781 = vmatpush1.msra.mxu0 %v5340_v15  ;;  %1672 = vmatprep.subr.mxu1 %v1671_v12  ;;  %4724 = vtanh.f32 %v1436_v18  ;;  %v5623_v18 = vpop.permute.xlu0 %1475 }
 0x1c2   :  { %1784 = vmatprep.subr.mxu0 %v5353_v41  ;;  %1584 = vmatprep.mubr.f32.mxu0 %v4784_v6  ;;  %v1424_v49 = vadd.f32 %v5388_v0, %v1331_v7  ;;  %4726 = vtanh.f32 %v1430_v53  ;;  %v6082_v0 = vand.u32 4294901760, %v5308_v62 }
 0x1c3   :  { %1678 = vmatpush1.msra.mxu1 %v1677_v35  ;;  %1787 = vmatpush1.msra.mxu0 %v5373_v8 }
 0x1c4   :  { %1590 = vmatmul.mubr.f32.gmra.mxu0 %v5439_v1  ;;  %1713 = vmatmul.mubr.f32.vlgmr.msra.gmra.mxu1 %v5268_v40  ;;  %4728 = vtanh.f32 %v1424_v49 }
 0x1c5   :  { %1878 = vmatprep.subr.mxu1 %v5321_v44  ;;  %1989 = vmatprep.subr.mxu0 %v6080_v20 }
 0x1c6   :  { %1880 = vmatpush1.msra.mxu1 %v5305_v48  ;;  %1595 = vmatprep.mubr.f32.mxu0 %v4784_v6 }
 0x1c7   :  { %1882 = vmatprep.subr.mxu1 %v5292_v57  ;;  %1718 = vmatprep.mubr.f32.mxu1 %v4784_v6 }
 0x1c8   :  { %1884 = vmatpush1.msra.mxu1 %v5294_v30  ;;  %1601 = vmatmul.mubr.f32.gmra.mxu0 %v5451_v13 }
 0x1c9   :  { %v4723_v28 = vpop.eup %4722  ;;  %1720 = vmatmul.mubr.f32.gmra.mxu1 %v5276_v11  ;;  %1886 = vmatprep.subr.mxu1 %v5299_v26 }
 0x1ca   :  { %1888 = vmatpush1.msra.mxu1 %v5301_v16  ;;  %1725 = vmatprep.mubr.f32.mxu1 %v4784_v6  ;;  %v5471_v60 = vand.u32 4294901760, %v4723_v28 }
 0x1cb   :  { %1890 = vmatprep.subr.mxu1 %v5315_v10  ;;  %1820 = vmatprep.mubr.f32.mxu0 %v4784_v6 }
 0x1cc   :  { %1892 = vmatpush1.msra.mxu1 %v5334_v36  ;;  %1823 = vmatmul.mubr.f32.vlgmr.msra.gmra.mxu0 %v5274_v56  ;;  %v5488_v17 = vsub.f32 %v4723_v28, %v5471_v60 }
 0x1cd   :  { %1727 = vmatmul.mubr.f32.gmra.mxu1 %v5319_v42  ;;  %1993 = vmatpush1.msra.mxu0 %v6081_v2  ;;  %v5632_v2 = vpop.permute.xlu0 %1463 }
 0x1ce   :  { %2104 = vmatprep.subr.mxu1 %v5321_v44  ;;  %1997 = vmatprep.subr.mxu0 %v6082_v0  ;;  %v4725_v62 = vpop.eup %4724  ;;  %v5501_v44 = vand.u32 4294901760, %v5488_v17 }
 0x1cf   :  { %2001 = vmatpush1.msra.mxu0 %v1651_v52  ;;  %1732 = vmatprep.mubr.f32.mxu1 %v4784_v6  ;;  %v4727_v29 = vpop.eup %4726  ;;  %v5507_v55 = vand.u32 4294901760, %v4725_v62 }
 0x1d0   :  { %1828 = vmatprep.mubr.f32.mxu0 %v4784_v6  ;;  %2005 = vmatprep.subr.mxu0 %v1657_v58  ;;  %v2317_v25 = vsub.f32 %v5488_v17, %v5501_v44  ;;  %v5514_v41 = vand.u32 4294901760, %v4727_v29 }
 0x1d1   :  { %1734 = vmatmul.mubr.f32.gmra.mxu1 %v5361_v33  ;;  %1831 = vmatmul.mubr.f32.gmra.mxu0 %v5287_v59  ;;  %v4729_v15 = vpop.eup %4728 }
 0x1d2   :  { %2009 = vmatpush1.msra.mxu0 %v1663_v14  ;;  %1836 = vmatprep.mubr.f32.mxu0 %v4784_v6  ;;  %v2318_v52 = vand.u32 4294901760, %v2317_v25 }
 0x1d3   :  { %2013 = vmatprep.subr.mxu0 %v1669_v63  ;;  %1925 = vmatprep.mubr.f32.mxu1 %v4784_v6 }
 0x1d4   :  { %2017 = vmatpush1.msra.mxu0 %v1675_v61 }
 0x1d5   :  { %4490 = vmatprep.subr.mxu0 %v5471_v60  ;;  %1839 = vmatmul.mubr.f32.gmra.mxu0 %v5356_v50 }
 0x1d6   :  { %1929 = vmatmul.mubr.f32.vlgmr.msra.gmra.mxu1 %v5284_v54  ;;  %1844 = vmatprep.mubr.f32.mxu0 %v4784_v6 }
 0x1d7   :  { %2106 = vmatpush1.msra.mxu1 %v5305_v48  ;;  %1934 = vmatprep.mubr.f32.mxu1 %v4784_v6  ;;  %v5523_v48 = vand.u32 4294901760, %v4729_v15 }
 0x1d8   :  { %2108 = vmatprep.subr.mxu1 %v5292_v57  ;;  %v2322_v57 = vsub.f32 %v4725_v62, %v5507_v55 }
 0x1d9   :  { %2110 = vmatpush1.msra.mxu1 %v5294_v30  ;;  %1847 = vmatmul.mubr.f32.gmra.mxu0 %v5400_v22  ;;  %v2329_v30 = vsub.f32 %v4727_v29, %v5514_v41  ;;  %v4778_v29 = vld [vmem:[%s6067_s2] sm:$0xff] }
 0x1da   :  { %2112 = vmatprep.subr.mxu1 %v5299_v26  ;;  %1938 = vmatmul.mubr.f32.gmra.mxu1 %v5330_v37  ;;  %v2323_v26 = vand.u32 4294901760, %v2322_v57 }
 0x1db   :  { %2114 = vmatpush1.msra.mxu1 %v5301_v16  ;;  %1943 = vmatprep.mubr.f32.mxu1 %v4784_v6  ;;  %v2336_v16 = vsub.f32 %v4729_v15, %v5523_v48 }
 0x1dc   :  { %2116 = vmatprep.subr.mxu1 %v5315_v10  ;;  %2050 = vmatprep.mubr.f32.mxu0 %v4784_v6  ;;  %v2330_v10 = vand.u32 4294901760, %v2329_v30 }
 0x1dd   :  { %2118 = vmatpush1.msra.mxu1 %v5334_v36  ;;  %2052 = vmatmul.mubr.f32.vlgmr.msra.gmra.mxu0 %v5268_v40  ;;  %v2324_v36 = vsub.f32 %v2322_v57, %v2323_v26  ;;  %v2337_v58 = vand.u32 4294901760, %v2336_v16 }
 0x1de   :  { %4504 = vmatprep.subr.mxu1 %v2318_v52  ;;  %1947 = vmatmul.mubr.f32.gmra.mxu1 %v5393_v24  ;;  %v2331_v8 = vsub.f32 %v2329_v30, %v2330_v10 }
 0x1df   :  { %4491 = vmatpush3.msra.mxu0 %v5471_v60  ;;  %1952 = vmatprep.mubr.f32.mxu1 %v4784_v6  ;;  %v2325_v14 = vand.u32 4294901760, %v2324_v36  ;;  %v2338_v63 = vsub.f32 %v2336_v16, %v2337_v58 }
 0x1e0   :  { %4492 = vmatprep.subr.mxu0 %v5507_v55  ;;  %2057 = vmatprep.mubr.f32.mxu0 %v4784_v6  ;;  %v2332_v61 = vand.u32 4294901760, %v2331_v8 }
 0x1e1   :  { %4493 = vmatpush3.msra.mxu0 %v5507_v55  ;;  %v2339_v3 = vand.u32 4294901760, %v2338_v63  ;;  %v4788_v63 = vmov 5  }
 0x1e2   :  { %4494 = vmatprep.subr.mxu0 %v5514_v41  ;;  %1956 = vmatmul.mubr.f32.gmra.mxu1 %v5426_v45 }
 0x1e3   :  { %2059 = vmatmul.mubr.f32.gmra.mxu0 %v5276_v11  ;;  %2151 = vmatprep.mubr.f32.mxu1 %v4784_v6 }
 0x1e4   :  { %4495 = vmatpush3.msra.mxu0 %v5514_v41  ;;  %2064 = vmatprep.mubr.f32.mxu0 %v4784_v6 }
 0x1e5   :  { %4496 = vmatprep.subr.mxu0 %v5523_v48 }
 0x1e6   :  { %4497 = vmatpush3.msra.mxu0 %v5523_v48  ;;  %2153 = vmatmul.mubr.f32.vlgmr.msra.gmra.mxu1 %v5268_v40 }
 0x1e7   :  { %4518 = vmatprep.subr.mxu0 %v5488_v17  ;;  %2066 = vmatmul.mubr.f32.gmra.mxu0 %v5319_v42 }
 0x1e8   :  { %4505 = vmatpush3.msra.mxu1 %v2318_v52  ;;  %2071 = vmatprep.mubr.f32.mxu0 %v4784_v6 }
 0x1e9   :  { %4506 = vmatprep.subr.mxu1 %v2325_v14  ;;  %2158 = vmatprep.mubr.f32.mxu1 %v4784_v6 }
 0x1ea   :  { %4507 = vmatpush3.msra.mxu1 %v2325_v14  ;;  %v5653_v14 = vld [vmem:[%s6067_s2 + $0x10] sm:$0xff] }
 0x1eb   :  { %4508 = vmatprep.subr.mxu1 %v2332_v61  ;;  %2073 = vmatmul.mubr.f32.gmra.mxu0 %v5361_v33 }
 0x1ec   :  { %2160 = vmatmul.mubr.f32.gmra.mxu1 %v5276_v11  ;;  %4498 = vmatprep.mubr.f32.mxu0 %v5350_v23 }
 0x1ed   :  { %4509 = vmatpush3.msra.mxu1 %v2332_v61  ;;  %2165 = vmatprep.mubr.f32.mxu1 %v4784_v6 }
 0x1ee   :  { %4510 = vmatprep.subr.mxu1 %v2339_v3 }
 0x1ef   :  { %4511 = vmatpush3.msra.mxu1 %v2339_v3  ;;  %4499 = vmatmul.mubr.f32.vlgmr.msra.gmra.mxu0 %v5416_v39 }
 0x1f0   :  { %4532 = vmatprep.subr.mxu1 %v5471_v60  ;;  %2167 = vmatmul.mubr.f32.gmra.mxu1 %v5319_v42 }
 0x1f1   :  { %4519 = vmatpush3.msra.mxu0 %v5488_v17  ;;  %2172 = vmatprep.mubr.f32.mxu1 %v4784_v6  ;;  %v4787_v17 = vmov 4  }
 0x1f2   :  { %4520 = vmatprep.subr.mxu0 %v2322_v57  ;;  %4501 = vmatprep.mubr.f32.mxu0 %v5439_v1  ;;  %v5615_v1 = vpop.permute.xlu1 %1471 }
 0x1f3   :  { %4521 = vmatpush3.msra.mxu0 %v2322_v57  ;;  %4676 = vset.pattern.permute.xlu1 %v4787_v17 }
 0x1f4   :  { %4522 = vmatprep.subr.mxu0 %v2329_v30  ;;  %2174 = vmatmul.mubr.f32.gmra.mxu1 %v5361_v33 }
 0x1f5   :  { %4502 = vmatmul.mubr.f32.gmra.mxu0 %v5451_v13  ;;  %4512 = vmatprep.mubr.f32.mxu1 %v5268_v40 }
 0x1f6   :  { %4523 = vmatpush3.msra.mxu0 %v2329_v30  ;;  %4526 = vmatprep.mubr.f32.mxu0 %v5274_v56  ;;  %v5625_v53 = vpop.permute.xlu1 %1467 }
 0x1f7   :  { %4524 = vmatprep.subr.mxu0 %v2336_v16  ;;  %4677 = vset.pattern.permute.xlu0 %v4787_v17 }
 0x1f8   :  { %4525 = vmatpush3.msra.mxu0 %v2336_v16  ;;  %4513 = vmatmul.mubr.f32.vlgmr.msra.gmra.mxu1 %v5276_v11 }
 0x1f9   :  { %4546 = vmatprep.subr.mxu0 %v5501_v44  ;;  %4527 = vmatmul.mubr.f32.vlgmr.msra.gmra.mxu0 %v5287_v59 }
 0x1fa   :  { %4533 = vmatpush3.msra.mxu1 %v5471_v60  ;;  %4547 = vmatpush3.msra.mxu0 %v5501_v44 }
 0x1fb   :  { %4534 = vmatprep.subr.mxu1 %v5507_v55  ;;  %4548 = vmatprep.subr.mxu0 %v2323_v26 }
 0x1fc   :  { %4535 = vmatpush3.msra.mxu1 %v5507_v55  ;;  %4549 = vmatpush3.msra.mxu0 %v2323_v26 }
 0x1fd   :  { %4515 = vmatprep.mubr.f32.mxu1 %v5319_v42  ;;  %4536 = vmatprep.subr.mxu1 %v5514_v41 }
 0x1fe   :  { %4550 = vmatprep.subr.mxu0 %v2330_v10  ;;  %4516 = vmatmul.mubr.f32.gmra.mxu1 %v5361_v33 }
 0x1ff   :  { %4537 = vmatpush3.msra.mxu1 %v5514_v41  ;;  %4551 = vmatpush3.msra.mxu0 %v2330_v10 }
 0x200   :  { %4529 = vmatprep.mubr.f32.mxu0 %v5356_v50  ;;  %4538 = vmatprep.subr.mxu1 %v5523_v48 }
 0x201   :  { %4552 = vmatprep.subr.mxu0 %v2337_v58  ;;  %4530 = vmatmul.mubr.f32.gmra.mxu0 %v5400_v22 }
 0x202   :  { %4539 = vmatpush3.msra.mxu1 %v5523_v48  ;;  %4553 = vmatpush3.msra.mxu0 %v2337_v58 }
 0x203   :  { %4540 = vmatprep.mubr.f32.mxu1 %v5284_v54  ;;  %4560 = vmatprep.subr.mxu1 %v5471_v60 }
 0x204   :  { %4541 = vmatmul.mubr.f32.vlgmr.msra.gmra.mxu1 %v5330_v37  ;;  %4554 = vmatprep.mubr.f32.mxu0 %v5268_v40 }
 0x205   :  { %4561 = vmatpush3.msra.mxu1 %v5471_v60  ;;  %4555 = vmatmul.mubr.f32.vlgmr.msra.gmra.mxu0 %v5276_v11 }
 0x206   :  { %4562 = vmatprep.subr.mxu1 %v5507_v55  ;;  %4543 = vmatprep.mubr.f32.mxu1 %v5393_v24 }
 0x207   :  { %4563 = vmatpush3.msra.mxu1 %v5507_v55  ;;  %4557 = vmatprep.mubr.f32.mxu0 %v5319_v42  ;;  %v4779_v55 = vld [vmem:[%s6067_s2 + $0x8] sm:$0xff] }
 0x208   :  { %4564 = vmatprep.subr.mxu1 %v5514_v41  ;;  %4544 = vmatmul.mubr.f32.gmra.mxu1 %v5426_v45 }
 0x209   :  { %4565 = vmatpush3.msra.mxu1 %v5514_v41  ;;  %4558 = vmatmul.mubr.f32.gmra.mxu0 %v5361_v33 }
 0x20a   :  { %4566 = vmatprep.subr.mxu1 %v5523_v48  ;;  %4568 = vmatprep.mubr.f32.mxu1 %v5268_v40 }
 0x20b   :  { %4567 = vmatpush3.msra.mxu1 %v5523_v48  ;;  %2911 = vmatprep.mubr.f32.mxu0 %v4784_v6 }
 0x20c   :  { %4569 = vmatmul.mubr.f32.vlgmr.msra.gmra.mxu1 %v5276_v11  ;;  %2812 = vperm.xlu1 %4676, %v4778_v29  }
 0x20d   :  { %4571 = vmatprep.mubr.f32.mxu1 %v5319_v42  ;;  %2816 = vperm.xlu0 %4677, %v4779_v55  }
 0x210   :  { %4572 = vmatmul.mubr.f32.gmra.mxu1 %v5361_v33  ;;  %2820 = vperm.xlu1 %4676, %v5653_v14  }
 0x211   :  { %3060 = vmatprep.mubr.f32.mxu1 %v4784_v6  ;;  %4678 = vset.pattern.permute.xlu0 %v4788_v63 }
 0x212   :  { %4156 = vperm.xlu0 %4678, %v4778_v29  }
 0x27a   :  { %v1569_v56 = vpop.f32.mrf.mxu0 }
 0x27b   :  { %v1570_v57 = vadd.f32 %v1569_v56, %v5632_v2 }
 0x27c   :  { %v1571_v54 = vpop.f32.mrf.mxu0 }
 0x27d   :  { %v1572_v52 = vadd.f32 %v1571_v54, %v5632_v2 }
 0x27f   :  { %v1580_v59 = vpop.f32.mrf.mxu0 }
 0x280   :  { %v1581_v49 = vadd.f32 %v1580_v59, %v5625_v53 }
 0x281   :  { %v1582_v37 = vpop.f32.mrf.mxu0 }
 0x282   :  { %v1583_v15 = vadd.f32 %v1582_v37, %v5625_v53 }
 0x284   :  { %v1591_v23 = vpop.f32.mrf.mxu0  ;;  %v5601_v50 = vpop.f32.mrf.mxu1 }
 0x285   :  { %v1592_v62 = vadd.f32 %v1591_v23, %v5615_v1  ;;  %v1715_v54 = vadd.f32 %v5601_v50, %v1570_v57  ;;  %v4781_v50 = vld [vmem:[%s6067_s2 + $0x18] sm:$0xff] }
 0x286   :  { %v1593_v40 = vpop.f32.mrf.mxu0  ;;  %v1716_v24 = vpop.f32.mrf.mxu1  ;;  %2824 = vperm.xlu1 %4676, %v4781_v50   ;;  %4168 = vperm.xlu0 %4678, %v4781_v50  }
 0x287   :  { %v1594_v10 = vadd.f32 %v1593_v40, %v5615_v1  ;;  %v1717_v61 = vadd.f32 %v1716_v24, %v1572_v52 }
 0x288   :  { %v1602_v22 = vpop.f32.mrf.mxu0 }
 0x289   :  { %v1721_v39 = vpop.f32.mrf.mxu1  ;;  %v1603_v36 = vadd.f32 %v1602_v22, %v5623_v18 }
 0x28a   :  { %v5603_v45 = vpop.f32.mrf.mxu0  ;;  %v1722_v25 = vadd.f32 %v1721_v39, %v1581_v49  ;;  %4679 = vset.pattern.permute.xlu1 %v4788_v63 }
 0x28b   :  { %v1723_v11 = vpop.f32.mrf.mxu1  ;;  %v1605_v40 = vadd.f32 %v5603_v45, %v5623_v18  ;;  %4160 = vperm.xlu1 %4679, %v4779_v55  }
 0x28c   :  { %v5605_v27 = vpop.f32.mrf.mxu0  ;;  %v1724_v30 = vadd.f32 %v1723_v11, %v1583_v15 }
 0x28d   :  { %v1728_v42 = vpop.f32.mrf.mxu1 }
 0x28e   :  { %v1826_v33 = vpop.f32.mrf.mxu0  ;;  %v1729_v58 = vadd.f32 %v1728_v42, %v1592_v62 }
 0x28f   :  { %v1730_v19 = vpop.f32.mrf.mxu1  ;;  %v1827_v22 = vadd.f32 %v1826_v33, %v1717_v61  ;;  %4164 = vperm.xlu1 %4679, %v5653_v14  }
 0x290   :  { %v1731_v59 = vadd.f32 %v1730_v19, %v1594_v10 }
 0x291   :  { %v5607_v34 = vpop.f32.mrf.mxu1  ;;  %v1832_v38 = vpop.f32.mrf.mxu0 }
 0x292   :  { %v1833_v26 = vadd.f32 %v1832_v38, %v1722_v25  ;;  %v1825_v38 = vadd.f32 %v5605_v27, %v1715_v54  ;;  %v1736_v49 = vadd.f32 %v5607_v34, %v1603_v36 }
 0x293   :  { %v5609_v31 = vpop.f32.mrf.mxu1  ;;  %v1834_v21 = vpop.f32.mrf.mxu0 }
 0x294   :  { %v1835_v3 = vadd.f32 %v1834_v21, %v1724_v30  ;;  %v1738_v19 = vadd.f32 %v5609_v31, %v1605_v40  ;;  %v4258_v30 = vld [vmem:[%s6069_s1 + $0x40] sm:$0xff] }
 0x295   :  { %v1840_v4 = vpop.f32.mrf.mxu0 }
 0x296   :  { %v5611_v12 = vpop.f32.mrf.mxu1  ;;  %v1841_v37 = vadd.f32 %v1840_v4, %v1729_v58  ;;  %v4259_v58 = vld [vmem:[%s6069_s1 + $0x48] sm:$0xff] }
 0x297   :  { %v1842_v51 = vpop.f32.mrf.mxu0 }
 0x298   :  { %v5613_v47 = vpop.f32.mrf.mxu1  ;;  %v1843_v24 = vadd.f32 %v1842_v51, %v1731_v59 }
 0x299   :  { %v5617_v5 = vpop.f32.mrf.mxu0  ;;  %v1933_v45 = vadd.f32 %v5613_v47, %v1827_v22 }
 0x29a   :  { %v1939_v32 = vpop.f32.mrf.mxu1  ;;  %v1849_v27 = vadd.f32 %v5617_v5, %v1736_v49 }
 0x29b   :  { %v5619_v35 = vpop.f32.mrf.mxu0  ;;  %v1940_v56 = vadd.f32 %v1939_v32, %v1833_v26 }
 0x29c   :  { %v1941_v46 = vpop.f32.mrf.mxu1  ;;  %v1851_v17 = vadd.f32 %v5619_v35, %v1738_v19 }
 0x29d   :  { %v5621_v43 = vpop.f32.mrf.mxu0  ;;  %v1942_v39 = vadd.f32 %v1941_v46, %v1835_v3  ;;  %v2831_v3 = vsel %vm128_vm0, %v4259_v58, 0 }
 0x29e   :  { %v1948_v13 = vpop.f32.mrf.mxu1 }
 0x29f   :  { %v5627_v20 = vpop.f32.mrf.mxu0  ;;  %v1949_v21 = vadd.f32 %v1948_v13, %v1841_v37  ;;  %v1931_v13 = vadd.f32 %v5611_v12, %v1825_v38  ;;  %v4789_v12 = vmov 6   ;;  %v5705_v37 = vand.u32 4294901760, %v2831_v3 }
 0x2a0   :  { %v1950_v7 = vpop.f32.mrf.mxu1  ;;  %v2056_v62 = vadd.f32 %v5627_v20, %v1933_v45  ;;  %4681 = vset.pattern.permute.xlu0 %v4789_v12  ;;  %4680 = vset.pattern.permute.xlu1 %v4789_v12 }
 0x2a1   :  { %v2054_v5 = vadd.f32 %v5621_v43, %v1931_v13 }
 0x2a2   :  { %v5630_v28 = vpop.f32.mrf.mxu1 }
 0x2a3   :  { %v2060_v60 = vpop.f32.mrf.mxu0  ;;  %v1958_v47 = vadd.f32 %v5630_v28, %v1849_v27 }
 0x2a4   :  { %v5634_v0 = vpop.f32.mrf.mxu1  ;;  %v2061_v11 = vadd.f32 %v2060_v60, %v1940_v56  ;;  %v1951_v60 = vadd.f32 %v1950_v7, %v1843_v24  ;;  %v5716_v24 = vsub.f32 %v2831_v3, %v5705_v37 }
 0x2a5   :  { %v2062_v44 = vpop.f32.mrf.mxu0  ;;  %v1960_v35 = vadd.f32 %v5634_v0, %v1851_v17 }
 0x2a6   :  { %v5644_v41 = vpop.f32.mrf.mxu1  ;;  %v2063_v33 = vadd.f32 %v2062_v44, %v1942_v39  ;;  %v4260_v39 = vld [vmem:[%s6069_s1 + $0x50] sm:$0xff] }
 0x2a7   :  { %v2067_v48 = vpop.f32.mrf.mxu0  ;;  %v2155_v28 = vadd.f32 %v5644_v41, %v2054_v5  ;;  %v2828_v41 = vsel %vm128_vm0, %v4258_v30, 0 }
 0x2a8   :  { %v2156_v16 = vpop.f32.mrf.mxu1  ;;  %v2068_v34 = vadd.f32 %v2067_v48, %v1949_v21  ;;  %v5697_v61 = vand.u32 4294901760, %v2828_v41 }
 0x2a9   :  { %v2069_v8 = vpop.f32.mrf.mxu0  ;;  %v2157_v7 = vadd.f32 %v2156_v16, %v2056_v62 }
 0x2aa   :  { %v2070_v44 = vadd.f32 %v2069_v8, %v1951_v60  ;;  %v19_v8 = vld [vmem:[%s6067_s2] sm:$0x1]  ;;  %v5703_v59 = vsub.f32 %v2828_v41, %v5697_v61 }
 0x2ab   :  { %v2074_v23 = vpop.f32.mrf.mxu0  ;;  %4212 = vperm.xlu1 %4680, %v19_v8  }
 0x2ac   :  { %v2161_v42 = vpop.f32.mrf.mxu1  ;;  %v2075_v20 = vadd.f32 %v2074_v23, %v1958_v47  ;;  %v5713_v49 = vand.u32 4294901760, %v5703_v59 }
 0x2ad   :  { %v2076_v32 = vpop.f32.mrf.mxu0  ;;  %v2162_v4 = vadd.f32 %v2161_v42, %v2061_v11 }
 0x2ae   :  { %v2163_v46 = vpop.f32.mrf.mxu1  ;;  %v2077_v43 = vadd.f32 %v2076_v32, %v1960_v35  ;;  %v5759_v35 = vand.u32 4294901760, %v5716_v24 }
 0x2af   :  { %v5667_v51 = vpop.f32.mrf.mxu0  ;;  %v2164_v29 = vadd.f32 %v2163_v46, %v2063_v33  ;;  %4730 = vtanh.f32 %v2162_v4  ;;  %v2834_v33 = vsel %vm128_vm0, %v4260_v39, 0 }
 0x2b0   :  { %v2168_v31 = vpop.f32.mrf.mxu1  ;;  %v5748_v5 = vand.u32 4294901760, %v2834_v33 }
 0x2b1   :  { %v2169_v25 = vadd.f32 %v2168_v31, %v2068_v34  ;;  %v5673_v15 = vpop.f32.mrf.mxu0 }
 0x2b2   :  { %v2170_v57 = vpop.f32.mrf.mxu1  ;;  %v5785_v3 = vsub.f32 %v2834_v33, %v5748_v5 }
 0x2b3   :  { %4732 = vtanh.f32 %v2169_v25  ;;  %v2171_v48 = vadd.f32 %v2170_v57, %v2070_v44  ;;  %v2915_v25 = vsub.f32 %v5703_v59, %v5713_v49 }
 0x2b4   :  { %4734 = vtanh.f32 %v2164_v29  ;;  %v2175_v52 = vpop.f32.mrf.mxu1  ;;  %v4261_v29 = vld [vmem:[%s6069_s1 + $0x58] sm:$0xff] }
 0x2b5   :  { %4736 = vtanh.f32 %v2171_v48  ;;  %v2176_v26 = vadd.f32 %v2175_v52, %v2075_v20  ;;  %v4503_v16 = vpop.f32.mrf.mxu0  ;;  %v5779_v58 = vand.u32 4294901760, %v2915_v25 }
 0x2b6   :  { %4738 = vtanh.f32 %v2157_v7  ;;  %v2177_v55 = vpop.f32.mrf.mxu1  ;;  %v2286_v32 = vadd.f32 %v4503_v16, %v5623_v18 }
 0x2b7   :  { %4740 = vtanh.f32 %v2176_v26  ;;  %v2178_v0 = vadd.f32 %v2177_v55, %v2077_v43  ;;  %v5682_v10 = vpop.f32.mrf.mxu0  ;;  %v2837_v43 = vsel %vm128_vm0, %v4261_v29, 0  ;;  %v2266_v29 = vadd.f32 %v5667_v51, %v5625_v53 }
 0x2b8   :  { %4742 = vtanh.f32 %v2155_v28  ;;  %v5685_v36 = vpop.f32.mrf.mxu1  ;;  %v5790_v39 = vand.u32 4294901760, %v2837_v43 }
 0x2b9   :  { %4744 = vtanh.f32 %v2178_v0  ;;  %v5693_v63 = vpop.f32.mrf.mxu0  ;;  %v2383_v51 = vadd.f32 %v5685_v36, %v2266_v29 }
 0x2ba   :  { %v5695_v14 = vpop.f32.mrf.mxu1  ;;  %v5829_v53 = vsub.f32 %v2837_v43, %v5790_v39 }
 0x2bb   :  { %v5700_v56 = vpop.f32.mrf.mxu0 }
 0x2bc   :  { %v4731_v23 = vpop.eup %4730 }
 0x2bd   :  { %v5730_v60 = vand.u32 4294901760, %v4731_v23 }
 0x2be   :  { %v4517_v54 = vpop.f32.mrf.mxu1 }
 0x2bf   :  { %v2395_v13 = vadd.f32 %v4517_v54, %v2286_v32  ;;  %v5769_v30 = vsub.f32 %v4731_v23, %v5730_v60 }
 0x2c0   :  { %v4733_v40 = vpop.eup %4732  ;;  %v5707_v22 = vpop.f32.mrf.mxu1 }
 0x2c1   :  { %v4735_v11 = vpop.eup %4734  ;;  %v4531_v42 = vpop.f32.mrf.mxu0  ;;  %v5723_v45 = vand.u32 4294901760, %v4733_v40 }
 0x2c2   :  { %v4737_v38 = vpop.eup %4736  ;;  %v5728_v27 = vand.u32 4294901760, %v4735_v11  ;;  %v2496_v26 = vadd.f32 %v4531_v42, %v2395_v13  ;;  %v3012_v13 = vand.u32 4294901760, %v5769_v30 }
 0x2c3   :  { %v4739_v21 = vpop.eup %4738  ;;  %v5719_v50 = vpop.f32.mrf.mxu0  ;;  %v5721_v19 = vand.u32 4294901760, %v4737_v38  ;;  %v5756_v12 = vsub.f32 %v4733_v40, %v5723_v45 }
 0x2c4   :  { %v4741_v4 = vpop.eup %4740  ;;  %v5726_v46 = vpop.f32.mrf.mxu1  ;;  %v5744_v44 = vand.u32 4294901760, %v4739_v21  ;;  %v5766_v52 = vsub.f32 %v4735_v11, %v5728_v27  ;;  %v2276_v11 = vadd.f32 %v5682_v10, %v5615_v1  ;;  %v3013_v36 = vsub.f32 %v5769_v30, %v3012_v13 }
 0x2c5   :  { %v4743_v34 = vpop.eup %4742  ;;  %v5732_v17 = vpop.f32.mrf.mxu0  ;;  %v5734_v18 = vand.u32 4294901760, %v4741_v4  ;;  %v5737_v62 = vsub.f32 %v4737_v38, %v5721_v19  ;;  %v3000_v40 = vand.u32 4294901760, %v5756_v12 }
 0x2c6   :  { %v4745_v31 = vpop.eup %4744  ;;  %v5742_v47 = vpop.f32.mrf.mxu1  ;;  %v5763_v28 = vand.u32 4294901760, %v4743_v34  ;;  %v5782_v8 = vsub.f32 %v4739_v21, %v5744_v44  ;;  %v3006_v32 = vand.u32 4294901760, %v5766_v52 }
 0x2c7   :  { %v5750_v7 = vand.u32 4294901760, %v4745_v31  ;;  %v5753_v57 = vsub.f32 %v4741_v4, %v5734_v18  ;;  %v5761_v48 = vpop.f32.mrf.mxu0  ;;  %v6075_v0 = vand.u32 4294901760, %v5737_v62  ;;  %v2926_v4 = vsub.f32 %v5716_v24, %v5759_v35 }
 0x2c8   :  { %v4545_v20 = vpop.f32.mrf.mxu1  ;;  %v5802_v33 = vsub.f32 %v4743_v34, %v5763_v28  ;;  %v2389_v34 = vadd.f32 %v5707_v22, %v2276_v11  ;;  %v3018_v25 = vand.u32 4294901760, %v5782_v8 }
 0x2c9   :  { %2864 = vmatprep.subr.mxu0 %v5750_v7  ;;  %v5774_v16 = vsub.f32 %v4745_v31, %v5750_v7  ;;  %v6076_v55 = vand.u32 4294901760, %v5753_v57  ;;  %v2597_v54 = vadd.f32 %v4545_v20, %v2496_v26  ;;  %v4559_v42 = vpop.f32.mrf.mxu0  ;;  %v2995_v10 = vsub.f32 %v5737_v62, %v6075_v0 }
 0x2ca   :  { %v2588_v41 = vpop.f32.mrf.mxu1  ;;  %2866 = vmatpush1.msra.mxu0 %v5734_v18  ;;  %v5822_v20 = vand.u32 4294901760, %v5785_v3  ;;  %v5845_v29 = vand.u32 4294901760, %v2926_v4  ;;  %v2482_v4 = vadd.f32 %v5693_v63, %v2383_v51 }
 0x2cb   :  { %2868 = vmatprep.subr.mxu0 %v5721_v19  ;;  %v6077_v23 = vand.u32 4294901760, %v5774_v16  ;;  %v2989_v21 = vsub.f32 %v5753_v57, %v6076_v55  ;;  %v2698_v26 = vadd.f32 %v4559_v42, %v2597_v54  ;;  %v3001_v55 = vsub.f32 %v5756_v12, %v3000_v40 }
 0x2cc   :  { %v5794_v38 = vpop.f32.mrf.mxu1  ;;  %2870 = vmatpush1.msra.mxu0 %v5723_v45  ;;  %v3007_v54 = vsub.f32 %v5766_v52, %v3006_v32  ;;  %v3024_v42 = vand.u32 4294901760, %v5802_v33  ;;  %v2996_v43 = vand.u32 4294901760, %v2995_v10 }
 0x2cd   :  { %2872 = vmatprep.subr.mxu0 %v5728_v27  ;;  %v2983_v1 = vsub.f32 %v5774_v16, %v6077_v23  ;;  %v2990_v11 = vand.u32 4294901760, %v2989_v21  ;;  %v2489_v21 = vadd.f32 %v5719_v50, %v2389_v34  ;;  %v3002_v10 = vand.u32 4294901760, %v3001_v55 }
 0x2ce   :  { %v5817_v31 = vpop.f32.mrf.mxu1  ;;  %2874 = vmatpush1.msra.mxu0 %v5730_v60  ;;  %v5855_v50 = vand.u32 4294901760, %v5829_v53  ;;  %v3014_v55 = vand.u32 4294901760, %v3013_v36 }
 0x2cf   :  { %2876 = vmatprep.subr.mxu0 %v5744_v44  ;;  %v2984_v0 = vand.u32 4294901760, %v2983_v1  ;;  %v2256_v1 = vadd.f32 %v5673_v15, %v5632_v2  ;;  %v3019_v2 = vsub.f32 %v5782_v8, %v3018_v25  ;;  %v2937_v15 = vsub.f32 %v5785_v3, %v5822_v20 }
 0x2d0   :  { %v4573_v22 = vpop.f32.mrf.mxu1  ;;  %2878 = vmatpush1.msra.mxu0 %v5763_v28  ;;  %v2589_v34 = vadd.f32 %v2588_v41, %v2489_v21 }
 0x2d1   :  { %v2791_v23 = vadd.f32 %v4573_v22, %v2698_v26  ;;  %2917 = vmatmul.mubr.f32.vlgmr.msra.gmra.mxu0 %v5779_v58  ;;  %2985 = vmatprep.subr.mxu1 %v2984_v0  ;;  %v2377_v0 = vadd.f32 %v5695_v14, %v2256_v1  ;;  %v3008_v26 = vand.u32 4294901760, %v3007_v54  ;;  %v3025_v14 = vsub.f32 %v5802_v33, %v3024_v42 }
 0x2d2   :  { %3115 = vmatprep.subr.mxu0 %v5774_v16  ;;  %2991 = vmatpush1.msra.mxu1 %v2990_v11  ;;  %v2581_v22 = vadd.f32 %v5726_v46, %v2482_v4  ;;  %v3020_v63 = vand.u32 4294901760, %v3019_v2  ;;  %v2784_v51 = vpop.f32.mrf.mxu1  ;;  %v5868_v11 = vand.u32 4294901760, %v2937_v15  ;;  %v2948_v54 = vsub.f32 %v5829_v53, %v5855_v50 }
 0x2d3   :  { %4746 = vtanh.f32 %v2791_v23  ;;  %3118 = vmatpush1.msra.mxu0 %v5753_v57  ;;  %2997 = vmatprep.subr.mxu1 %v2996_v43  ;;  %v2691_v23 = vpop.f32.mrf.mxu0  ;;  %v2475_v41 = vadd.f32 %v5700_v56, %v2377_v0  ;;  %v3026_v46 = vand.u32 4294901760, %v3025_v14 }
 0x2d4   :  { %3121 = vmatprep.subr.mxu0 %v5737_v62  ;;  %2922 = vmatprep.mubr.f32.mxu0 %v4784_v6  ;;  %v2692_v1 = vadd.f32 %v2691_v23, %v2589_v34  ;;  %v2686_v56 = vadd.f32 %v5732_v17, %v2581_v22  ;;  %v5880_v21 = vand.u32 4294901760, %v2948_v54 }
 0x2d5   :  { %3003 = vmatpush1.msra.mxu1 %v3002_v10  ;;  %3124 = vmatpush1.msra.mxu0 %v5756_v12  ;;  %v2573_v43 = vadd.f32 %v5742_v47, %v2475_v41  ;;  %v6083_v47 = vand.u32 4294901760, %v5774_v16  ;;  %v6084_v16 = vand.u32 4294901760, %v5753_v57 }
 0x2d6   :  { %2928 = vmatmul.mubr.f32.gmra.mxu0 %v5845_v29  ;;  %3009 = vmatprep.subr.mxu1 %v3008_v26  ;;  %v2785_v36 = vadd.f32 %v2784_v51, %v2692_v1  ;;  %v2779_v2 = vadd.f32 %v5794_v38, %v2686_v56 }
 0x2d7   :  { %3127 = vmatprep.subr.mxu0 %v5766_v52  ;;  %3015 = vmatpush1.msra.mxu1 %v3014_v55  ;;  %v2680_v15 = vadd.f32 %v5761_v48, %v2573_v43 }
 0x2d8   :  { %3130 = vmatpush1.msra.mxu0 %v5769_v30  ;;  %3021 = vmatprep.subr.mxu1 %v3020_v63  ;;  %4748 = vtanh.f32 %v2785_v36 }
 0x2d9   :  { %3133 = vmatprep.subr.mxu0 %v5782_v8  ;;  %2933 = vmatprep.mubr.f32.mxu0 %v4784_v6  ;;  %v2773_v17 = vadd.f32 %v5817_v31, %v2680_v15  ;;  %4750 = vtanh.f32 %v2779_v2  ;;  %v6085_v31 = vand.u32 4294901760, %v5737_v62  ;;  %v6034_v2 = vpop.permute.xlu1 %2812 }
 0x2da   :  { %3027 = vmatpush1.msra.mxu1 %v3026_v46  ;;  %3136 = vmatpush1.msra.mxu0 %v5802_v33 }
 0x2db   :  { %2939 = vmatmul.mubr.f32.gmra.mxu0 %v5868_v11  ;;  %3062 = vmatmul.mubr.f32.vlgmr.msra.gmra.mxu1 %v5697_v61  ;;  %4752 = vtanh.f32 %v2773_v17 }
 0x2dc   :  { %3227 = vmatprep.subr.mxu1 %v5750_v7  ;;  %3338 = vmatprep.subr.mxu0 %v6083_v47 }
 0x2dd   :  { %3229 = vmatpush1.msra.mxu1 %v5734_v18  ;;  %2944 = vmatprep.mubr.f32.mxu0 %v4784_v6 }
 0x2de   :  { %3231 = vmatprep.subr.mxu1 %v5721_v19  ;;  %3067 = vmatprep.mubr.f32.mxu1 %v4784_v6 }
 0x2df   :  { %3233 = vmatpush1.msra.mxu1 %v5723_v45  ;;  %2950 = vmatmul.mubr.f32.gmra.mxu0 %v5880_v21 }
 0x2e0   :  { %v4747_v38 = vpop.eup %4746  ;;  %3069 = vmatmul.mubr.f32.gmra.mxu1 %v5705_v37  ;;  %3235 = vmatprep.subr.mxu1 %v5728_v27 }
 0x2e1   :  { %3237 = vmatpush1.msra.mxu1 %v5730_v60  ;;  %3074 = vmatprep.mubr.f32.mxu1 %v4784_v6  ;;  %v5900_v48 = vand.u32 4294901760, %v4747_v38 }
 0x2e2   :  { %3239 = vmatprep.subr.mxu1 %v5744_v44  ;;  %3169 = vmatprep.mubr.f32.mxu0 %v4784_v6 }
 0x2e3   :  { %3241 = vmatpush1.msra.mxu1 %v5763_v28  ;;  %3172 = vmatmul.mubr.f32.vlgmr.msra.gmra.mxu0 %v5703_v59  ;;  %v5917_v0 = vsub.f32 %v4747_v38, %v5900_v48 }
 0x2e4   :  { %3076 = vmatmul.mubr.f32.gmra.mxu1 %v5748_v5  ;;  %3342 = vmatpush1.msra.mxu0 %v6084_v16 }
 0x2e5   :  { %3453 = vmatprep.subr.mxu1 %v5750_v7  ;;  %3346 = vmatprep.subr.mxu0 %v6085_v31  ;;  %v4749_v62 = vpop.eup %4748  ;;  %v5930_v7 = vand.u32 4294901760, %v5917_v0  ;;  %v6038_v31 = vpop.permute.xlu0 %2816 }
 0x2e6   :  { %3350 = vmatpush1.msra.mxu0 %v3000_v40  ;;  %3081 = vmatprep.mubr.f32.mxu1 %v4784_v6  ;;  %v4751_v57 = vpop.eup %4750  ;;  %v5936_v12 = vand.u32 4294901760, %v4749_v62 }
 0x2e7   :  { %3177 = vmatprep.mubr.f32.mxu0 %v4784_v6  ;;  %3354 = vmatprep.subr.mxu0 %v3006_v32  ;;  %v3666_v52 = vsub.f32 %v5917_v0, %v5930_v7  ;;  %v5943_v8 = vand.u32 4294901760, %v4751_v57 }
 0x2e8   :  { %3083 = vmatmul.mubr.f32.gmra.mxu1 %v5790_v39  ;;  %3180 = vmatmul.mubr.f32.gmra.mxu0 %v5716_v24  ;;  %v4753_v30 = vpop.eup %4752 }
 0x2e9   :  { %3358 = vmatpush1.msra.mxu0 %v3012_v13  ;;  %3185 = vmatprep.mubr.f32.mxu0 %v4784_v6  ;;  %v3667_v40 = vand.u32 4294901760, %v3666_v52 }
 0x2ea   :  { %3362 = vmatprep.subr.mxu0 %v3018_v25  ;;  %3274 = vmatprep.mubr.f32.mxu1 %v4784_v6 }
 0x2eb   :  { %3366 = vmatpush1.msra.mxu0 %v3024_v42 }
 0x2ec   :  { %4574 = vmatprep.subr.mxu0 %v5900_v48  ;;  %3188 = vmatmul.mubr.f32.gmra.mxu0 %v5785_v3 }
 0x2ed   :  { %3278 = vmatmul.mubr.f32.vlgmr.msra.gmra.mxu1 %v5713_v49  ;;  %3193 = vmatprep.mubr.f32.mxu0 %v4784_v6 }
 0x2ee   :  { %3455 = vmatpush1.msra.mxu1 %v5734_v18  ;;  %3283 = vmatprep.mubr.f32.mxu1 %v4784_v6  ;;  %v5952_v18 = vand.u32 4294901760, %v4753_v30 }
 0x2ef   :  { %3457 = vmatprep.subr.mxu1 %v5721_v19  ;;  %v3671_v19 = vsub.f32 %v4749_v62, %v5936_v12 }
 0x2f0   :  { %3459 = vmatpush1.msra.mxu1 %v5723_v45  ;;  %3196 = vmatmul.mubr.f32.gmra.mxu0 %v5829_v53  ;;  %v3678_v45 = vsub.f32 %v4751_v57, %v5943_v8 }
 0x2f1   :  { %3461 = vmatprep.subr.mxu1 %v5728_v27  ;;  %3287 = vmatmul.mubr.f32.gmra.mxu1 %v5759_v35  ;;  %v3672_v27 = vand.u32 4294901760, %v3671_v19 }
 0x2f2   :  { %3463 = vmatpush1.msra.mxu1 %v5730_v60  ;;  %3292 = vmatprep.mubr.f32.mxu1 %v4784_v6  ;;  %v3685_v60 = vsub.f32 %v4753_v30, %v5952_v18 }
 0x2f3   :  { %3465 = vmatprep.subr.mxu1 %v5744_v44  ;;  %3399 = vmatprep.mubr.f32.mxu0 %v4784_v6  ;;  %v3679_v44 = vand.u32 4294901760, %v3678_v45 }
 0x2f4   :  { %3467 = vmatpush1.msra.mxu1 %v5763_v28  ;;  %3401 = vmatmul.mubr.f32.vlgmr.msra.gmra.mxu0 %v5697_v61  ;;  %v3673_v28 = vsub.f32 %v3671_v19, %v3672_v27  ;;  %v3686_v32 = vand.u32 4294901760, %v3685_v60 }
 0x2f5   :  { %4588 = vmatprep.subr.mxu1 %v3667_v40  ;;  %3296 = vmatmul.mubr.f32.gmra.mxu1 %v5822_v20  ;;  %v3680_v33 = vsub.f32 %v3678_v45, %v3679_v44 }
 0x2f6   :  { %4575 = vmatpush3.msra.mxu0 %v5900_v48  ;;  %3301 = vmatprep.mubr.f32.mxu1 %v4784_v6  ;;  %v3674_v13 = vand.u32 4294901760, %v3673_v28  ;;  %v3687_v25 = vsub.f32 %v3685_v60, %v3686_v32 }
 0x2f7   :  { %4576 = vmatprep.subr.mxu0 %v5936_v12  ;;  %3406 = vmatprep.mubr.f32.mxu0 %v4784_v6  ;;  %v3681_v42 = vand.u32 4294901760, %v3680_v33 }
 0x2f8   :  { %4577 = vmatpush3.msra.mxu0 %v5936_v12  ;;  %v3688_v10 = vand.u32 4294901760, %v3687_v25 }
 0x2f9   :  { %4578 = vmatprep.subr.mxu0 %v5943_v8  ;;  %3305 = vmatmul.mubr.f32.gmra.mxu1 %v5855_v50 }
 0x2fa   :  { %3408 = vmatmul.mubr.f32.gmra.mxu0 %v5705_v37  ;;  %3500 = vmatprep.mubr.f32.mxu1 %v4784_v6 }
 0x2fb   :  { %4579 = vmatpush3.msra.mxu0 %v5943_v8  ;;  %3413 = vmatprep.mubr.f32.mxu0 %v4784_v6 }
 0x2fc   :  { %4580 = vmatprep.subr.mxu0 %v5952_v18 }
 0x2fd   :  { %4581 = vmatpush3.msra.mxu0 %v5952_v18  ;;  %3502 = vmatmul.mubr.f32.vlgmr.msra.gmra.mxu1 %v5697_v61 }
 0x2fe   :  { %4602 = vmatprep.subr.mxu0 %v5917_v0  ;;  %3415 = vmatmul.mubr.f32.gmra.mxu0 %v5748_v5 }
 0x2ff   :  { %4589 = vmatpush3.msra.mxu1 %v3667_v40  ;;  %3420 = vmatprep.mubr.f32.mxu0 %v4784_v6 }
 0x300   :  { %4590 = vmatprep.subr.mxu1 %v3674_v13  ;;  %3507 = vmatprep.mubr.f32.mxu1 %v4784_v6 }
 0x301   :  { %4591 = vmatpush3.msra.mxu1 %v3674_v13 }
 0x302   :  { %4592 = vmatprep.subr.mxu1 %v3681_v42  ;;  %3422 = vmatmul.mubr.f32.gmra.mxu0 %v5790_v39 }
 0x303   :  { %3509 = vmatmul.mubr.f32.gmra.mxu1 %v5705_v37  ;;  %4582 = vmatprep.mubr.f32.mxu0 %v5779_v58 }
 0x304   :  { %4593 = vmatpush3.msra.mxu1 %v3681_v42  ;;  %3514 = vmatprep.mubr.f32.mxu1 %v4784_v6 }
 0x305   :  { %4594 = vmatprep.subr.mxu1 %v3688_v10 }
 0x306   :  { %4595 = vmatpush3.msra.mxu1 %v3688_v10  ;;  %4583 = vmatmul.mubr.f32.vlgmr.msra.gmra.mxu0 %v5845_v29 }
 0x307   :  { %4616 = vmatprep.subr.mxu1 %v5900_v48  ;;  %3516 = vmatmul.mubr.f32.gmra.mxu1 %v5748_v5 }
 0x308   :  { %4603 = vmatpush3.msra.mxu0 %v5917_v0  ;;  %3521 = vmatprep.mubr.f32.mxu1 %v4784_v6 }
 0x309   :  { %4604 = vmatprep.subr.mxu0 %v3671_v19  ;;  %4585 = vmatprep.mubr.f32.mxu0 %v5868_v11 }
 0x30a   :  { %4605 = vmatpush3.msra.mxu0 %v3671_v19 }
 0x30b   :  { %4606 = vmatprep.subr.mxu0 %v3678_v45  ;;  %3523 = vmatmul.mubr.f32.gmra.mxu1 %v5790_v39 }
 0x30c   :  { %4586 = vmatmul.mubr.f32.gmra.mxu0 %v5880_v21  ;;  %4596 = vmatprep.mubr.f32.mxu1 %v5697_v61 }
 0x30d   :  { %4607 = vmatpush3.msra.mxu0 %v3678_v45  ;;  %4610 = vmatprep.mubr.f32.mxu0 %v5703_v59 }
 0x30e   :  { %4608 = vmatprep.subr.mxu0 %v3685_v60 }
 0x30f   :  { %4609 = vmatpush3.msra.mxu0 %v3685_v60  ;;  %4597 = vmatmul.mubr.f32.vlgmr.msra.gmra.mxu1 %v5705_v37 }
 0x310   :  { %4630 = vmatprep.subr.mxu0 %v5930_v7  ;;  %4611 = vmatmul.mubr.f32.vlgmr.msra.gmra.mxu0 %v5716_v24 }
 0x311   :  { %4617 = vmatpush3.msra.mxu1 %v5900_v48  ;;  %4631 = vmatpush3.msra.mxu0 %v5930_v7 }
 0x312   :  { %4618 = vmatprep.subr.mxu1 %v5936_v12  ;;  %4632 = vmatprep.subr.mxu0 %v3672_v27 }
 0x313   :  { %4619 = vmatpush3.msra.mxu1 %v5936_v12  ;;  %4633 = vmatpush3.msra.mxu0 %v3672_v27 }
 0x314   :  { %4599 = vmatprep.mubr.f32.mxu1 %v5748_v5  ;;  %4620 = vmatprep.subr.mxu1 %v5943_v8 }
 0x315   :  { %4634 = vmatprep.subr.mxu0 %v3679_v44  ;;  %4600 = vmatmul.mubr.f32.gmra.mxu1 %v5790_v39 }
 0x316   :  { %4621 = vmatpush3.msra.mxu1 %v5943_v8  ;;  %4635 = vmatpush3.msra.mxu0 %v3679_v44 }
 0x317   :  { %4613 = vmatprep.mubr.f32.mxu0 %v5785_v3  ;;  %4622 = vmatprep.subr.mxu1 %v5952_v18 }
 0x318   :  { %4636 = vmatprep.subr.mxu0 %v3686_v32  ;;  %4614 = vmatmul.mubr.f32.gmra.mxu0 %v5829_v53 }
 0x319   :  { %4623 = vmatpush3.msra.mxu1 %v5952_v18  ;;  %4637 = vmatpush3.msra.mxu0 %v3686_v32 }
 0x31a   :  { %4624 = vmatprep.mubr.f32.mxu1 %v5713_v49  ;;  %4644 = vmatprep.subr.mxu1 %v5900_v48 }
 0x31b   :  { %4625 = vmatmul.mubr.f32.vlgmr.msra.gmra.mxu1 %v5759_v35  ;;  %4638 = vmatprep.mubr.f32.mxu0 %v5697_v61 }
 0x31c   :  { %4645 = vmatpush3.msra.mxu1 %v5900_v48  ;;  %4639 = vmatmul.mubr.f32.vlgmr.msra.gmra.mxu0 %v5705_v37  ;;  %v6036_v48 = vpop.permute.xlu1 %2820 }
 0x31d   :  { %4646 = vmatprep.subr.mxu1 %v5936_v12  ;;  %4627 = vmatprep.mubr.f32.mxu1 %v5822_v20 }
 0x31e   :  { %4647 = vmatpush3.msra.mxu1 %v5936_v12  ;;  %4641 = vmatprep.mubr.f32.mxu0 %v5748_v5 }
 0x31f   :  { %4648 = vmatprep.subr.mxu1 %v5943_v8  ;;  %4628 = vmatmul.mubr.f32.gmra.mxu1 %v5855_v50 }
 0x320   :  { %4649 = vmatpush3.msra.mxu1 %v5943_v8  ;;  %4642 = vmatmul.mubr.f32.gmra.mxu0 %v5790_v39 }
 0x321   :  { %4650 = vmatprep.subr.mxu1 %v5952_v18  ;;  %4652 = vmatprep.mubr.f32.mxu1 %v5697_v61 }
 0x322   :  { %4651 = vmatpush3.msra.mxu1 %v5952_v18  ;;  %v6044_v18 = vpop.permute.xlu1 %2824 }
 0x323   :  { %4653 = vmatmul.mubr.f32.vlgmr.msra.gmra.mxu1 %v5705_v37 }
 0x324   :  { %4655 = vmatprep.mubr.f32.mxu1 %v5748_v5 }
 0x327   :  { %4656 = vmatmul.mubr.f32.gmra.mxu1 %v5790_v39 }
 0x391   :  { %v2918_v6 = vpop.f32.mrf.mxu0 }
 0x392   :  { %v2919_v8 = vadd.f32 %v2918_v6, %v6034_v2 }
 0x393   :  { %v2920_v59 = vpop.f32.mrf.mxu0 }
 0x394   :  { %v2921_v7 = vadd.f32 %v2920_v59, %v6034_v2 }
 0x396   :  { %v2929_v49 = vpop.f32.mrf.mxu0 }
 0x397   :  { %v2930_v57 = vadd.f32 %v2929_v49, %v6038_v31 }
 0x398   :  { %v2931_v24 = vpop.f32.mrf.mxu0 }
 0x399   :  { %v2932_v52 = vadd.f32 %v2931_v24, %v6038_v31 }
 0x39b   :  { %v2940_v35 = vpop.f32.mrf.mxu0  ;;  %v3063_v58 = vpop.f32.mrf.mxu1 }
 0x39c   :  { %v2941_v27 = vadd.f32 %v2940_v35, %v6036_v48  ;;  %v3064_v59 = vadd.f32 %v3063_v58, %v2919_v8 }
 0x39d   :  { %v2942_v3 = vpop.f32.mrf.mxu0  ;;  %v3065_v20 = vpop.f32.mrf.mxu1 }
 0x39e   :  { %v3066_v19 = vadd.f32 %v3065_v20, %v2921_v7  ;;  %v2943_v60 = vadd.f32 %v2942_v3, %v6036_v48 }
 0x39f   :  { %v2951_v53 = vpop.f32.mrf.mxu0 }
 0x3a0   :  { %v3070_v29 = vpop.f32.mrf.mxu1  ;;  %v2952_v25 = vadd.f32 %v2951_v53, %v6044_v18 }
 0x3a1   :  { %v2953_v50 = vpop.f32.mrf.mxu0  ;;  %v3071_v28 = vadd.f32 %v3070_v29, %v2930_v57 }
 0x3a2   :  { %v3072_v61 = vpop.f32.mrf.mxu1  ;;  %v2954_v49 = vadd.f32 %v2953_v50, %v6044_v18 }
 0x3a3   :  { %v3173_v4 = vpop.f32.mrf.mxu0  ;;  %v3073_v45 = vadd.f32 %v3072_v61, %v2932_v52 }
 0x3a4   :  { %v3077_v34 = vpop.f32.mrf.mxu1  ;;  %v3174_v3 = vadd.f32 %v3173_v4, %v3064_v59 }
 0x3a5   :  { %v3175_v26 = vpop.f32.mrf.mxu0  ;;  %v3078_v61 = vadd.f32 %v3077_v34, %v2941_v27 }
 0x3a6   :  { %v3079_v37 = vpop.f32.mrf.mxu1  ;;  %v3176_v32 = vadd.f32 %v3175_v26, %v3066_v19 }
 0x3a7   :  { %v3080_v13 = vadd.f32 %v3079_v37, %v2943_v60 }
 0x3a8   :  { %v3084_v14 = vpop.f32.mrf.mxu1  ;;  %v3181_v5 = vpop.f32.mrf.mxu0 }
 0x3a9   :  { %v3182_v6 = vadd.f32 %v3181_v5, %v3071_v28  ;;  %v3085_v57 = vadd.f32 %v3084_v14, %v2952_v25 }
 0x3aa   :  { %v3086_v23 = vpop.f32.mrf.mxu1  ;;  %v3183_v39 = vpop.f32.mrf.mxu0 }
 0x3ab   :  { %v3184_v42 = vadd.f32 %v3183_v39, %v3073_v45  ;;  %v3087_v9 = vadd.f32 %v3086_v23, %v2954_v49 }
 0x3ac   :  { %v3189_v55 = vpop.f32.mrf.mxu0 }
 0x3ad   :  { %v3279_v22 = vpop.f32.mrf.mxu1  ;;  %v3190_v37 = vadd.f32 %v3189_v55, %v3078_v61 }
 0x3ae   :  { %v3191_v63 = vpop.f32.mrf.mxu0  ;;  %v3280_v45 = vadd.f32 %v3279_v22, %v3174_v3 }
 0x3af   :  { %v3281_v41 = vpop.f32.mrf.mxu1  ;;  %v3192_v7 = vadd.f32 %v3191_v63, %v3080_v13 }
 0x3b0   :  { %v6028_v51 = vpop.f32.mrf.mxu0  ;;  %v3282_v24 = vadd.f32 %v3281_v41, %v3176_v32 }
 0x3b1   :  { %v3288_v11 = vpop.f32.mrf.mxu1 }
 0x3b2   :  { %v3199_v54 = vpop.f32.mrf.mxu0  ;;  %v3289_v29 = vadd.f32 %v3288_v11, %v3182_v6 }
 0x3b3   :  { %v3290_v1 = vpop.f32.mrf.mxu1  ;;  %v3200_v58 = vadd.f32 %v3199_v54, %v3087_v9 }
 0x3b4   :  { %v6030_v46 = vpop.f32.mrf.mxu0  ;;  %v3291_v35 = vadd.f32 %v3290_v1, %v3184_v42  ;;  %v3198_v1 = vadd.f32 %v6028_v51, %v3085_v57 }
 0x3b5   :  { %v3297_v43 = vpop.f32.mrf.mxu1  ;;  %v3403_v4 = vadd.f32 %v6030_v46, %v3280_v45 }
 0x3b6   :  { %v3404_v56 = vpop.f32.mrf.mxu0  ;;  %v3298_v41 = vadd.f32 %v3297_v43, %v3190_v37 }
 0x3b7   :  { %v3299_v36 = vpop.f32.mrf.mxu1  ;;  %v3405_v26 = vadd.f32 %v3404_v56, %v3282_v24 }
 0x3b8   :  { %v3300_v19 = vadd.f32 %v3299_v36, %v3192_v7  ;;  %v4157_v7 = vpop.permute.xlu0 %4156 }
 0x3b9   :  { %v6032_v21 = vpop.f32.mrf.mxu1 }
 0x3ba   :  { %v3409_v47 = vpop.f32.mrf.mxu0  ;;  %v3307_v22 = vadd.f32 %v6032_v21, %v3198_v1 }
 0x3bb   :  { %v3308_v15 = vpop.f32.mrf.mxu1  ;;  %v3410_v5 = vadd.f32 %v3409_v47, %v3289_v29 }
 0x3bc   :  { %v3411_v17 = vpop.f32.mrf.mxu0  ;;  %v3309_v23 = vadd.f32 %v3308_v15, %v3200_v58 }
 0x3bd   :  { %v3503_v38 = vpop.f32.mrf.mxu1  ;;  %v3412_v53 = vadd.f32 %v3411_v17, %v3291_v35 }
 0x3be   :  { %v3416_v16 = vpop.f32.mrf.mxu0  ;;  %v3504_v9 = vadd.f32 %v3503_v38, %v3403_v4 }
 0x3bf   :  { %v3505_v0 = vpop.f32.mrf.mxu1  ;;  %v3417_v55 = vadd.f32 %v3416_v16, %v3298_v41  ;;  %v4169_v41 = vpop.permute.xlu0 %4168 }
 0x3c0   :  { %v3418_v62 = vpop.f32.mrf.mxu0  ;;  %v3506_v8 = vadd.f32 %v3505_v0, %v3405_v26 }
 0x3c1   :  { %v3419_v60 = vadd.f32 %v3418_v62, %v3300_v19 }
 0x3c2   :  { %v3423_v12 = vpop.f32.mrf.mxu0  ;;  %4754 = vtanh.f32 %v3506_v8 }
 0x3c3   :  { %v3510_v30 = vpop.f32.mrf.mxu1  ;;  %v3424_v0 = vadd.f32 %v3423_v12, %v3307_v22 }
 0x3c4   :  { %v3425_v40 = vpop.f32.mrf.mxu0  ;;  %v3511_v11 = vadd.f32 %v3510_v30, %v3410_v5 }
 0x3c5   :  { %v3512_v44 = vpop.f32.mrf.mxu1  ;;  %v3426_v54 = vadd.f32 %v3425_v40, %v3309_v23 }
 0x3c6   :  { %v4584_v33 = vpop.f32.mrf.mxu0  ;;  %v3513_v34 = vadd.f32 %v3512_v44, %v3412_v53 }
 0x3c7   :  { %v3517_v10 = vpop.f32.mrf.mxu1  ;;  %v3615_v46 = vadd.f32 %v4584_v33, %v6038_v31  ;;  %v6057_v31 = vpop.permute.xlu1 %4160 }
 0x3c8   :  { %v3604_v20 = vpop.f32.mrf.mxu0  ;;  %4756 = vtanh.f32 %v3513_v34  ;;  %v3518_v43 = vadd.f32 %v3517_v10, %v3417_v55 }
 0x3c9   :  { %v3519_v52 = vpop.f32.mrf.mxu1  ;;  %4758 = vtanh.f32 %v3511_v11  ;;  %v3605_v38 = vadd.f32 %v3604_v20, %v6034_v2 }
 0x3ca   :  { %v3520_v56 = vadd.f32 %v3519_v52, %v3419_v60 }
 0x3cb   :  { %v3524_v39 = vpop.f32.mrf.mxu1  ;;  %v4165_v37 = vpop.permute.xlu1 %4164 }
 0x3cc   :  { %v4587_v50 = vpop.f32.mrf.mxu0  ;;  %4760 = vtanh.f32 %v3520_v56  ;;  %v3525_v15 = vadd.f32 %v3524_v39, %v3424_v0 }
 0x3cd   :  { %v3526_v63 = vpop.f32.mrf.mxu1  ;;  %4762 = vtanh.f32 %v3504_v9  ;;  %v3635_v30 = vadd.f32 %v4587_v50, %v6044_v18 }
 0x3ce   :  { %v3624_v14 = vpop.f32.mrf.mxu0  ;;  %v3527_v51 = vadd.f32 %v3526_v63, %v3426_v54  ;;  %4764 = vtanh.f32 %v3518_v43 }
 0x3cf   :  { %v4598_v36 = vpop.f32.mrf.mxu1  ;;  %v3625_v32 = vadd.f32 %v3624_v14, %v6036_v48  ;;  %v4755_v42 = vpop.eup %4754 }
 0x3d0   :  { %v4612_v47 = vpop.f32.mrf.mxu0  ;;  %4766 = vtanh.f32 %v3527_v51  ;;  %v3732_v40 = vadd.f32 %v4598_v36, %v3615_v46  ;;  %v4172_v58 = vmul.f32 %v4755_v42, %v4157_v7 }
 0x3d1   :  { %v3725_v17 = vpop.f32.mrf.mxu1  ;;  %4768 = vtanh.f32 %v3525_v15 }
 0x3d2   :  { %v3823_v16 = vpop.f32.mrf.mxu0  ;;  %v3726_v12 = vadd.f32 %v3725_v17, %v3605_v38  ;;  %v3831_v13 = vadd.f32 %v4612_v47, %v3732_v40 }
 0x3d4   :  { %v3824_v6 = vadd.f32 %v3823_v16, %v3726_v12 }
 0x3d5   :  { %v4601_v62 = vpop.f32.mrf.mxu1  ;;  %v4757_v59 = vpop.eup %4756 }
 0x3d6   :  { %v3744_v33 = vadd.f32 %v4601_v62, %v3635_v30  ;;  %v4759_v18 = vpop.eup %4758  ;;  %v4175_v48 = vmul.f32 %v4757_v59, %v6057_v31 }
 0x3d7   :  { %v3737_v21 = vpop.f32.mrf.mxu1  ;;  %v4174_v5 = vmul.f32 %v4759_v18, %v6057_v31 }
 0x3d8   :  { %v4615_v27 = vpop.f32.mrf.mxu0  ;;  %v3738_v49 = vadd.f32 %v3737_v21, %v3625_v32  ;;  %v4192_v23 = vadd.f32 %v4175_v48, %v4172_v58 }
 0x3d9   :  { %v4761_v61 = vpop.eup %4760  ;;  %v3845_v35 = vadd.f32 %v4615_v27, %v3744_v33 }
 0x3da   :  { %v3837_v44 = vpop.f32.mrf.mxu0  ;;  %v4763_v3 = vpop.eup %4762  ;;  %v4178_v8 = vmul.f32 %v4761_v61, %v4165_v37 }
 0x3db   :  { %v4626_v28 = vpop.f32.mrf.mxu1  ;;  %v4765_v57 = vpop.eup %4764  ;;  %v3838_v19 = vadd.f32 %v3837_v44, %v3738_v49  ;;  %v4171_v4 = vmul.f32 %v4763_v3, %v4157_v7 }
 0x3dc   :  { %v4640_v25 = vpop.f32.mrf.mxu0  ;;  %v3930_v2 = vadd.f32 %v4626_v28, %v3831_v13  ;;  %v4177_v55 = vmul.f32 %v4765_v57, %v4165_v37  ;;  %v4193_v54 = vadd.f32 %v4192_v23, %v4178_v8 }
 0x3dd   :  { %v3921_v10 = vpop.f32.mrf.mxu1  ;;  %v4767_v45 = vpop.eup %4766  ;;  %v4183_v9 = vadd.f32 %v4174_v5, %v4171_v4 }
 0x3de   :  { %v4028_v24 = vpop.f32.mrf.mxu0  ;;  %v3922_v52 = vadd.f32 %v3921_v10, %v3824_v6  ;;  %v4035_v53 = vadd.f32 %v4640_v25, %v3930_v2  ;;  %v4769_v1 = vpop.eup %4768  ;;  %v4181_v56 = vmul.f32 %v4767_v45, %v4169_v41 }
 0x3df   :  { %v4629_v20 = vpop.f32.mrf.mxu1  ;;  %v4180_v43 = vmul.f32 %v4769_v1, %v4169_v41  ;;  %v4184_v46 = vadd.f32 %v4183_v9, %v4177_v55 }
 0x3e0   :  { %v4643_v26 = vpop.f32.mrf.mxu0  ;;  %v3946_v39 = vadd.f32 %v4629_v20, %v3845_v35  ;;  %v4029_v60 = vadd.f32 %v4028_v24, %v3922_v52  ;;  %v4194_v15 = vadd.f32 %v4193_v54, %v4181_v56  ;;  %v4790_v35 = vmov 1966171168  }
 0x3e1   :  { %v3937_v29 = vpop.f32.mrf.mxu1  ;;  %v4185_v62 = vadd.f32 %v4184_v46, %v4180_v43  ;;  %v4223_v52 = vunpack.c.l.s4 %v4790_v35 }
 0x3e2   :  { %v3938_v34 = vadd.f32 %v3937_v29, %v3838_v19  ;;  %v4040_v11 = vpop.f32.mrf.mxu0  ;;  %v4047_v36 = vadd.f32 %v4643_v26, %v3946_v39  ;;  %v4195_v21 = vrot.slane %v4194_v15, 4  ;;  %v4213_v26 = vpop.permute.xlu1 %4212  ;;  %v6086_v39 = vld [vmem:[#allocation2_spill] sm:$0xff] }
 0x3e3   :  { %v4654_v50 = vpop.f32.mrf.mxu1  ;;  %v4186_v38 = vrot.slane %v4185_v62, 4 }
 0x3e4   :  { %v4128_v63 = vadd.f32 %v4654_v50, %v4035_v53  ;;  %v4041_v17 = vadd.f32 %v4040_v11, %v3938_v34  ;;  %v4196_v30 = vadd.f32 %v4195_v21, %v4194_v15  ;;  %v6087_v34 = vlaneseq }
 0x3e5   :  { %v4121_v14 = vpop.f32.mrf.mxu1  ;;  %v4187_v27 = vadd.f32 %v4186_v38, %v4185_v62 }
 0x3e6   :  { %v4122_v22 = vadd.f32 %v4121_v14, %v4029_v60  ;;  %4770 = vtanh.f32 %v4128_v63  ;;  %v4197_v28 = vrot.slane %v4196_v30, 2  ;;  %vm4247_vm1 = vcmp.lt.s32.totalorder %v6087_v34, 384 }
 0x3e7   :  { %v4657_v47 = vpop.f32.mrf.mxu1  ;;  %v4188_v33 = vrot.slane %v4187_v27, 2 }
 0x3e8   :  { %4772 = vtanh.f32 %v4122_v22  ;;  %v4140_v0 = vadd.f32 %v4657_v47, %v4047_v36  ;;  %v4198_v10 = vadd.f32 %v4197_v28, %v4196_v30 }
 0x3e9   :  { %v4133_v51 = vpop.f32.mrf.mxu1  ;;  %v4189_v49 = vadd.f32 %v4188_v33, %v4187_v27 }
 0x3ea   :  { %v4134_v16 = vadd.f32 %v4133_v51, %v4041_v17  ;;  %4774 = vtanh.f32 %v4140_v0  ;;  %v4199_v24 = vrot.slane %v4198_v10, 1 }
 0x3eb   :  { %v4190_v20 = vrot.slane %v4189_v49, 1 }
 0x3ec   :  { %4776 = vtanh.f32 %v4134_v16  ;;  %v4200_v3 = vadd.f32 %v4199_v24, %v4198_v10 }
 0x3ed   :  { %v4191_v48 = vadd.f32 %v4190_v20, %v4189_v49 }
 0x3ee   :  { %v4216_v19 = vadd.f32 %v4213_v26, %v4200_v3 }
 0x3ef   :  { %v4215_v53 = vadd.f32 %v4213_v26, %v4191_v48 }
 0x3f1   :  { %v4221_v5 = vcombine.low %v4215_v53, %v4216_v19 }
 0x3f3   :  { %v4771_v40 = vpop.eup %4770 }
 0x3f4   :  { %v4176_v13 = vmul.f32 %v4771_v40, %v6057_v31  ;;  %v4224_v31 = vunpack.c.0.s8 %v4223_v52 }
 0x3f5   :  { %v4773_v12 = vpop.eup %4772 }
 0x3f6   :  { %v4173_v44 = vmul.f32 %v4773_v12, %v4157_v7  ;;  %v4227_v45 = vsub.s32 %v4224_v31, %v6086_v39 }
 0x3f7   :  { %v4775_v32 = vpop.eup %4774 }
 0x3f8   :  { %v4201_v59 = vadd.f32 %v4176_v13, %v4173_v44  ;;  %v4182_v6 = vmul.f32 %v4775_v32, %v4169_v41  ;;  %v4228_v50 = vrot.slane %v4221_v5, %v4227_v45 }
 0x3f9   :  { %v4777_v25 = vpop.eup %4776 }
 0x3fa   :  { %v4179_v42 = vmul.f32 %v4777_v25, %v4165_v37 }
 0x3fc   :  { %v4202_v2 = vadd.f32 %v4201_v59, %v4179_v42 }
 0x3fe   :  { %v4203_v18 = vadd.f32 %v4202_v2, %v4182_v6 }
 0x400   :  { %v4204_v61 = vrot.slane %v4203_v18, 4 }
 0x402   :  { %v4205_v7 = vadd.f32 %v4204_v61, %v4203_v18 }
 0x404   :  { %v4206_v29 = vrot.slane %v4205_v7, 2 }
 0x406   :  { %v4207_v57 = vadd.f32 %v4206_v29, %v4205_v7 }
 0x408   :  { %v4208_v37 = vrot.slane %v4207_v57, 1 }
 0x40a   :  { %v4209_v58 = vadd.f32 %v4208_v37, %v4207_v57 }
 0x40c   :  { %v4217_v8 = vadd.f32 %v4213_v26, %v4209_v58 }
 0x40e   :  { %v4235_v41 = vrot.slane %v4217_v8, %v4227_v45 }
 0x410   :  { %v4236_v60 = vcombine.low %v4228_v50, %v4235_v41 }
 0x412   :  { %v4243_v63 = vrot.slane %v4236_v60, %v4227_v45 }
 0x414   :  { %4249 = vst.msk [vmem:[%s6070_s3] sm:$0x7] %vm4247_vm1, %v4243_v63 }

</bundles_post_ra>
